<compile_context>
chip_gen: v5e
topology: v5e:2x2
jax: 0.10.0
libtpu: 0.0.40
codegen_flags: <defaults>
</compile_context>

<pallas_src>
import functools

import jax
import jax.numpy as jnp
from jax.experimental import pallas as pl
from jax.experimental.pallas import tpu as pltpu


def _round_up(n: int, m: int) -> int:
    return ((n + m - 1) // m) * m


def dnn_kernel(x_ref, w1_ref, b1_ref, w2_ref, b2_ref, w3_ref, b3_ref, o_ref):
    # Three fused Linear+ReLU layers; matmuls hit the MXU with f32 accumulation.
    cdt = w1_ref.dtype
    x = x_ref[...].astype(cdt)  # cast on the VPU in-kernel (no wrapper HBM pass)

    h = jnp.dot(x, w1_ref[...], preferred_element_type=jnp.float32) + b1_ref[...]
    h = jnp.maximum(h, 0.0)

    h = jnp.dot(h.astype(cdt), w2_ref[...],
                preferred_element_type=jnp.float32) + b2_ref[...]
    h = jnp.maximum(h, 0.0)

    h = jnp.dot(h.astype(cdt), w3_ref[...],
                preferred_element_type=jnp.float32) + b3_ref[...]
    h = jnp.maximum(h, 0.0)

    o_ref[...] = h.astype(o_ref.dtype)


def prepare_params(w1, b1, w2, b2, w3, b3, *, compute_dtype=jnp.float32):
    """One-time relayout: PyTorch (out,in) weights -> (in,out).

    Only the *output* (N) dims are padded to lane-dense multiples of 128.
    The contraction (K) dims are left as-is (w1 keeps in_dim rows); h1/h2
    are padded as N of the previous layer and therefore already match as K
    of the next layer.  Biases stay f32 (added to the f32 accumulator).
    Returns a pytree of arrays only (no Python ints -> safe under jit).
    """
    in_dim = w1.shape[1]
    h1, h2, out_dim = w1.shape[0], w2.shape[0], w3.shape[0]
    h1_p = _round_up(h1, 128)
    h2_p = _round_up(h2, 128)
    out_p = _round_up(out_dim, 128)

    def pad_wt(w, rows_p, cols_p):
        wt = jnp.asarray(w).T.astype(compute_dtype)  # (in, out)
        return jnp.pad(wt, ((0, rows_p - wt.shape[0]), (0, cols_p - wt.shape[1])))

    def pad_b(b, cols_p):
        bb = jnp.asarray(b).astype(jnp.float32)
        return jnp.pad(bb, (0, cols_p - bb.shape[0])).reshape(1, cols_p)

    return {
        "w1": pad_wt(w1, in_dim, h1_p), "b1": pad_b(b1, h1_p),   # K not padded
        "w2": pad_wt(w2, h1_p, h2_p),   "b2": pad_b(b2, h2_p),
        "w3": pad_wt(w3, h2_p, out_p),  "b3": pad_b(b3, out_p),
    }


@functools.partial(jax.jit, static_argnames=("out_dim", "trim"))
def dnn_forward(x, params, *, out_dim, trim=True):
    """x: (B, in_dim) unpadded. Returns (B, out_dim) in the compute dtype when
    trim=True, else the padded lane-dense (b_pad, out_p) block."""
    B, in_dim = x.shape
    assert params["w1"].shape[0] == in_dim
    out_p = params["w3"].shape[1]
    out_dtype = params["w1"].dtype   # bf16 path -> bf16 output (half writeback)

    # Batch tiling:
    #  - small B: single grid step (no per-step pipeline overhead), tile
    #    rounded to 16 so bf16 sublane pairs stay fully packed;
    #  - mid B: >=2 "parallel" steps so v7x's second TensorCore gets work
    #    (harmless ~0.35us extra on 1-TC v5e/v6e);
    #  - large B: 512-row tiles (halves step count vs 256, VMEM still tiny).
    if B <= 256:
        tb = _round_up(B, 16)
    elif B <= 1024:
        tb = _round_up((B + 1) // 2, 128)
    else:
        tb = 512
    b_pad = _round_up(B, tb)

    xp = x if b_pad == B else jnp.pad(x, ((0, b_pad - B), (0, 0)))

    def resident(arr):  # grid-invariant: DMA'd once, stays in VMEM
        return pl.BlockSpec(arr.shape, lambda i: (0, 0))

    out = pl.pallas_call(
        dnn_kernel,
        out_shape=jax.ShapeDtypeStruct((b_pad, out_p), out_dtype),
        grid_spec=pltpu.PrefetchScalarGridSpec(
            num_scalar_prefetch=0,
            grid=(b_pad // tb,),
            in_specs=[
                pl.BlockSpec((tb, in_dim), lambda i: (i, 0)),   # x tile over batch
                resident(params["w1"]), resident(params["b1"]),
                resident(params["w2"]), resident(params["b2"]),
                resident(params["w3"]), resident(params["b3"]),
            ],
            out_specs=pl.BlockSpec((tb, out_p), lambda i: (i, 0)),
        ),
        compiler_params=pltpu.CompilerParams(
            dimension_semantics=("parallel",),
        ),
    )(xp, params["w1"], params["b1"], params["w2"], params["b2"],
      params["w3"], params["b3"])

    if trim:
        out = out[:B, :out_dim]   # out_dim is static -> static slice
    return out


def reference_forward(x, w1, b1, w2, b2, w3, b3):
    h = jnp.maximum(x @ w1.T + b1, 0.0)
    h = jnp.maximum(h @ w2.T + b2, 0.0)
    h = jnp.maximum(h @ w3.T + b3, 0.0)
    return h


if __name__ == "__main__":
    # MNIST-like DNN shapes: 784 -> 300 -> 100 -> 10, small batch.
    B, in_dim, n_hidden1, n_hidden2, out_dim = 32, 784, 300, 100, 10

    key = jax.random.PRNGKey(0)
    kx, k1, k2, k3, kb1, kb2, kb3 = jax.random.split(key, 7)

    x = jax.random.normal(kx, (B, in_dim), dtype=jnp.float32)

    def init_linear(kw, kb, fan_in, fan_out):
        bound = 1.0 / (fan_in ** 0.5)
        w = jax.random.uniform(kw, (fan_out, fan_in), minval=-bound, maxval=bound,
                               dtype=jnp.float32)
        b = jax.random.uniform(kb, (fan_out,), minval=-bound, maxval=bound,
                               dtype=jnp.float32)
        return w, b

    w1, b1 = init_linear(k1, kb1, in_dim, n_hidden1)
    w2, b2 = init_linear(k2, kb2, n_hidden1, n_hidden2)
    w3, b3 = init_linear(k3, kb3, n_hidden2, out_dim)

    ref = reference_forward(x, w1, b1, w2, b2, w3, b3)

    # f32 operand path: exact-semantics check.
    params_f32 = prepare_params(w1, b1, w2, b2, w3, b3, compute_dtype=jnp.float32)
    out_f32 = jax.block_until_ready(dnn_forward(x, params_f32, out_dim=out_dim))
    assert out_f32.shape == (B, out_dim)
    assert jnp.allclose(out_f32, ref, atol=1e-4, rtol=1e-4), "f32 path mismatch"

    # bf16 operand path (v5e/v6e/v7x MXU-friendly), f32 accumulation, bf16 output.
    params_bf16 = prepare_params(w1, b1, w2, b2, w3, b3, compute_dtype=jnp.bfloat16)
    out_bf16 = jax.block_until_ready(dnn_forward(x, params_bf16, out_dim=out_dim))
    assert out_bf16.shape == (B, out_dim)
    assert jnp.allclose(out_bf16.astype(jnp.float32), ref, atol=5e-2, rtol=5e-2), \
        "bf16 path mismatch"

    print("KERNEL_OK")
</pallas_src>

<mosaic_0001>
module attributes {stable_mosaic.version = 11 : i64} {
  func.func @dnn_kernel(%arg0: i32, %arg1: memref<32x784xf32, #tpu.memory_space<vmem>>, %arg2: memref<784x384xf32, #tpu.memory_space<vmem>>, %arg3: memref<1x384xf32, #tpu.memory_space<vmem>>, %arg4: memref<384x128xf32, #tpu.memory_space<vmem>>, %arg5: memref<1x128xf32, #tpu.memory_space<vmem>>, %arg6: memref<128x128xf32, #tpu.memory_space<vmem>>, %arg7: memref<1x128xf32, #tpu.memory_space<vmem>>, %arg8: memref<32x128xf32, #tpu.memory_space<vmem>>) attributes {dimension_semantics = [#tpu.dimension_semantics<parallel>], iteration_bounds = array<i64: 1>, scalar_prefetch = 0 : i64, scratch_operands = 0 : i64, tpu.core_type = #tpu.core_type<tc>, window_params = [{transform_indices = @transform_0, window_bounds = array<i64: 32, 784>}, {pipeline_mode = #tpu.pipeline_mode<synchronous>, transform_indices = @transform_1, window_bounds = array<i64: 784, 384>}, {pipeline_mode = #tpu.pipeline_mode<synchronous>, transform_indices = @transform_2, window_bounds = array<i64: 1, 384>}, {pipeline_mode = #tpu.pipeline_mode<synchronous>, transform_indices = @transform_3, window_bounds = array<i64: 384, 128>}, {pipeline_mode = #tpu.pipeline_mode<synchronous>, transform_indices = @transform_4, window_bounds = array<i64: 1, 128>}, {pipeline_mode = #tpu.pipeline_mode<synchronous>, transform_indices = @transform_5, window_bounds = array<i64: 128, 128>}, {pipeline_mode = #tpu.pipeline_mode<synchronous>, transform_indices = @transform_6, window_bounds = array<i64: 1, 128>}, {transform_indices = @transform_7, window_bounds = array<i64: 32, 128>}]} {
    %c0 = arith.constant 0 : index
    %c0_0 = arith.constant 0 : index
    %0 = vector.load %arg1[%c0, %c0_0] : memref<32x784xf32, #tpu.memory_space<vmem>>, vector<32x784xf32>
    %c0_1 = arith.constant 0 : index
    %c0_2 = arith.constant 0 : index
    %1 = vector.load %arg2[%c0_1, %c0_2] : memref<784x384xf32, #tpu.memory_space<vmem>>, vector<784x384xf32>
    %cst = arith.constant dense<0.000000e+00> : vector<32x384xf32>
    %2 = tpu.matmul %0, %1, %cst {dimension_numbers = #tpu.dot_dimension_numbers<[1], [0], [0], [1], [0, 0, 1, 1], [], []>} : vector<32x784xf32>, vector<784x384xf32>, vector<32x384xf32> -> vector<32x384xf32>
    %c0_3 = arith.constant 0 : index
    %c0_4 = arith.constant 0 : index
    %3 = vector.load %arg3[%c0_3, %c0_4] : memref<1x384xf32, #tpu.memory_space<vmem>>, vector<1x384xf32>
    %4 = vector.broadcast %3 : vector<1x384xf32> to vector<32x384xf32>
    %5 = arith.addf %2, %4 : vector<32x384xf32>
    %cst_5 = arith.constant 0.000000e+00 : f32
    %6 = vector.broadcast %cst_5 : f32 to vector<32x384xf32>
    %7 = arith.maximumf %5, %6 : vector<32x384xf32>
    %c0_6 = arith.constant 0 : index
    %c0_7 = arith.constant 0 : index
    %8 = vector.load %arg4[%c0_6, %c0_7] : memref<384x128xf32, #tpu.memory_space<vmem>>, vector<384x128xf32>
    %cst_8 = arith.constant dense<0.000000e+00> : vector<32x128xf32>
    %9 = tpu.matmul %7, %8, %cst_8 {dimension_numbers = #tpu.dot_dimension_numbers<[1], [0], [0], [1], [0, 0, 1, 1], [], []>} : vector<32x384xf32>, vector<384x128xf32>, vector<32x128xf32> -> vector<32x128xf32>
    %c0_9 = arith.constant 0 : index
    %c0_10 = arith.constant 0 : index
    %10 = vector.load %arg5[%c0_9, %c0_10] : memref<1x128xf32, #tpu.memory_space<vmem>>, vector<1x128xf32>
    %11 = vector.broadcast %10 : vector<1x128xf32> to vector<32x128xf32>
    %12 = arith.addf %9, %11 : vector<32x128xf32>
    %cst_11 = arith.constant 0.000000e+00 : f32
    %13 = vector.broadcast %cst_11 : f32 to vector<32x128xf32>
    %14 = arith.maximumf %12, %13 : vector<32x128xf32>
    %c0_12 = arith.constant 0 : index
    %c0_13 = arith.constant 0 : index
    %15 = vector.load %arg6[%c0_12, %c0_13] : memref<128x128xf32, #tpu.memory_space<vmem>>, vector<128x128xf32>
    %cst_14 = arith.constant dense<0.000000e+00> : vector<32x128xf32>
    %16 = tpu.matmul %14, %15, %cst_14 {dimension_numbers = #tpu.dot_dimension_numbers<[1], [0], [0], [1], [0, 0, 1, 1], [], []>} : vector<32x128xf32>, vector<128x128xf32>, vector<32x128xf32> -> vector<32x128xf32>
    %c0_15 = arith.constant 0 : index
    %c0_16 = arith.constant 0 : index
    %17 = vector.load %arg7[%c0_15, %c0_16] : memref<1x128xf32, #tpu.memory_space<vmem>>, vector<1x128xf32>
    %18 = vector.broadcast %17 : vector<1x128xf32> to vector<32x128xf32>
    %19 = arith.addf %16, %18 : vector<32x128xf32>
    %cst_17 = arith.constant 0.000000e+00 : f32
    %20 = vector.broadcast %cst_17 : f32 to vector<32x128xf32>
    %21 = arith.maximumf %19, %20 : vector<32x128xf32>
    %c0_18 = arith.constant 0 : index
    %c0_19 = arith.constant 0 : index
    %22 = vector.load %arg8[%c0_18, %c0_19] : memref<32x128xf32, #tpu.memory_space<vmem>>, vector<32x128xf32>
    tpu.vector_store %arg8[%c0_18, %c0_19], %21 {strides = array<i32>} : memref<32x128xf32, #tpu.memory_space<vmem>>, vector<32x128xf32>,
    return
  }
  func.func @transform_0(%arg0: i32) -> (i32, i32) {
    %c0_i32 = arith.constant 0 : i32
    %c0_i32_0 = arith.constant 0 : i32
    return %arg0, %c0_i32 : i32, i32
  }
  func.func @transform_1(%arg0: i32) -> (i32, i32) {
    %c0_i32 = arith.constant 0 : i32
    %c0_i32_0 = arith.constant 0 : i32
    %c0_i32_1 = arith.constant 0 : i32
    return %c0_i32, %c0_i32_0 : i32, i32
  }
  func.func @transform_2(%arg0: i32) -> (i32, i32) {
    %c0_i32 = arith.constant 0 : i32
    %c0_i32_0 = arith.constant 0 : i32
    %c0_i32_1 = arith.constant 0 : i32
    return %c0_i32, %c0_i32_0 : i32, i32
  }
  func.func @transform_3(%arg0: i32) -> (i32, i32) {
    %c0_i32 = arith.constant 0 : i32
    %c0_i32_0 = arith.constant 0 : i32
    %c0_i32_1 = arith.constant 0 : i32
    return %c0_i32, %c0_i32_0 : i32, i32
  }
  func.func @transform_4(%arg0: i32) -> (i32, i32) {
    %c0_i32 = arith.constant 0 : i32
    %c0_i32_0 = arith.constant 0 : i32
    %c0_i32_1 = arith.constant 0 : i32
    return %c0_i32, %c0_i32_0 : i32, i32
  }
  func.func @transform_5(%arg0: i32) -> (i32, i32) {
    %c0_i32 = arith.constant 0 : i32
    %c0_i32_0 = arith.constant 0 : i32
    %c0_i32_1 = arith.constant 0 : i32
    return %c0_i32, %c0_i32_0 : i32, i32
  }
  func.func @transform_6(%arg0: i32) -> (i32, i32) {
    %c0_i32 = arith.constant 0 : i32
    %c0_i32_0 = arith.constant 0 : i32
    %c0_i32_1 = arith.constant 0 : i32
    return %c0_i32, %c0_i32_0 : i32, i32
  }
  func.func @transform_7(%arg0: i32) -> (i32, i32) {
    %c0_i32 = arith.constant 0 : i32
    %c0_i32_0 = arith.constant 0 : i32
    return %arg0, %c0_i32 : i32, i32
  }
}

</mosaic_0001>

<bundles_post_ra>
// kernel: dnn_forward.1
= control target key start
LH: loop header
LB: loop body
LE: loop exit
PB: predicated region body
PF: predicated region fallthrough
CT: control target
= control target key end

     0   :  { %12 = vsyncpa [#allocation3], 0  ;;  %s1855_s0 = inlined_call_operand.hbm [shape: f32[32,784], index: 0, kind: input, shape index: {}]   ;;  %s1856_s1 = inlined_call_operand.hbm [shape: f32[784,384], index: 1, kind: input, shape index: {}]   ;;  %s1857_s2 = inlined_call_operand.hbm [shape: f32[1,384], index: 2, kind: input, shape index: {}]   ;;  %s1858_s3 = inlined_call_operand.hbm [shape: f32[384,128], index: 3, kind: input, shape index: {}]   ;;  %s1859_s4 = inlined_call_operand.hbm [shape: f32[1,128], index: 4, kind: input, shape index: {}]   ;;  %s1860_s5 = inlined_call_operand.hbm [shape: f32[128,128], index: 5, kind: input, shape index: {}]   ;;  %s1861_s6 = inlined_call_operand.hbm [shape: f32[1,128], index: 6, kind: input, shape index: {}]   ;;  %s1862_s7 = inlined_call_operand.vmem [shape: f32[32,128], index: 7, kind: output, shape index: {}]  }
   0x1   :  { %13 = vsyncpa [#allocation5], 0 }
   0x2   :  { %14 = vsyncpa [#allocation8], 0  ;;  %s33_s26 = sshll.u32 %s1856_s1, 4  ;;  %s34_s26 = int_to_ptr.hbm [resolvable:$true] %s33_s26 }
   0x3   :  { %15 = vsyncpa [#allocation11], 0  ;;  %s1560_s27 = smov [#allocation4]   ;;  %s57_s8 = sshll.u32 %s1858_s3, 4  ;;  %s58_s8 = int_to_ptr.hbm [resolvable:$true] %s57_s8 }
   0x4   :  { %s35_s28 = sshll.u32 %s1560_s27, 4  ;;  %s1561_s9 = smov 384   ;;  %s36_s28 = int_to_ptr.vmem [resolvable:$true] %s35_s28 }
   0x5   :  { %s1562_s10 = smov 24   ;;  %s1563_s11 = smov [#allocation7]  }
   0x6   :  { %41 = dma.hbm_to_vmem [thread:$0]  %s34_s26, 37632, %s36_s28, [#allocation5], %s1561_s9, %s1561_s9, %s1562_s10  }
   0x7   :  { %s59_s12 = sshll.u32 %s1563_s11, 4  ;;  %s1564_s13 = smov 128   ;;  %s60_s12 = int_to_ptr.vmem [resolvable:$true] %s59_s12 }
   0x8   :  { %s1565_s14 = smov 8   ;;  %s81_s16 = sshll.u32 %s1860_s5, 4  ;;  %s82_s16 = int_to_ptr.hbm [resolvable:$true] %s81_s16 }
   0x9   :  { %65 = dma.hbm_to_vmem [thread:$0]  %s58_s8, 6144, %s60_s12, [#allocation8], %s1564_s13, %s1564_s13, %s1565_s14  }
   0xa   :  { %s1566_s17 = smov [#allocation10]   ;;  %s20_s20 = sshll.u32 %s1855_s0, 4  ;;  %s21_s20 = int_to_ptr.hbm [resolvable:$true] %s20_s20 }
   0xb   :  { %s83_s18 = sshll.u32 %s1566_s17, 4  ;;  %s1567_s21 = smov [#allocation2]   ;;  %s84_s18 = int_to_ptr.vmem [resolvable:$true] %s83_s18 }
   0xc   :  { %89 = dma.hbm_to_vmem [thread:$0]  %s82_s16, 2048, %s84_s18, [#allocation11], %s1564_s13, %s1564_s13, %s1565_s14  }
   0xd   :  { %s22_s22 = sshll.u32 %s1567_s21, 4  ;;  %s1568_s23 = smov 896   ;;  %s23_s22 = int_to_ptr.vmem [resolvable:$true] %s22_s22 }
   0xe   :  { %s1569_s24 = smov 56   ;;  %s47_s5 = sshll.u32 %s1857_s2, 4  ;;  %s48_s5 = int_to_ptr.hbm [resolvable:$true] %s47_s5 }
   0xf   :  { %28 = dma.hbm_to_vmem [thread:$0]  %s21_s20, 3584, %s23_s22, [#allocation3], %s1568_s23, %s1568_s23, %s1569_s24  }
  0x10   :  { %s1570_s27 = smov [#allocation6]   ;;  %s71_s0 = sshll.u32 %s1859_s4, 4  ;;  %s72_s0 = int_to_ptr.hbm [resolvable:$true] %s71_s0 }
  0x11   :  { %s49_s28 = sshll.u32 %s1570_s27, 4  ;;  %s1571_s8 = smov [#allocation9]   ;;  %s50_s28 = int_to_ptr.vmem [resolvable:$true] %s49_s28 }
  0x12   :  { %52 = dma.hbm_to_vmem [thread:$0]  %s48_s5, 48, %s50_s28, [#allocation5]  }
  0x13   :  { %s73_s9 = sshll.u32 %s1571_s8, 4  ;;  %s95_s12 = sshll.u32 %s1861_s6, 4  ;;  %s74_s9 = int_to_ptr.vmem [resolvable:$true] %s73_s9  ;;  %s96_s12 = int_to_ptr.hbm [resolvable:$true] %s95_s12 }
  0x14   :  { %76 = dma.hbm_to_vmem [thread:$0]  %s72_s0, 16, %s74_s9, [#allocation8]  }
  0x15   :  { %s1572_s2 = smov [#allocation12]  }
  0x16   :  { %s97_s13 = sshll.u32 %s1572_s2, 4  ;;  %s98_s13 = int_to_ptr.vmem [resolvable:$true] %s97_s13 }
  0x17   :  { %100 = dma.hbm_to_vmem [thread:$0]  %s96_s12, 16, %s98_s13, [#allocation11]  }
  0x18   :  { %1552 = dma.done.wait [#allocation3], 3584  }
  0x19   :  { %1553 = vsyncadd [#allocation3], 4294963712 }
  0x1a   :  { %1554 = dma.done.wait [#allocation5], 37680  }
  0x1b   :  { %1555 = vsyncadd [#allocation5], 4294929616 }
  0x1c   :  { %1556 = dma.done.wait [#allocation8], 6160  }
  0x1d   :  { %1557 = vsyncadd [#allocation8], 4294961136 }
  0x1e   :  { %1558 = dma.done.wait [#allocation11], 2064  }
  0x1f   :  { %1559 = vsyncadd [#allocation11], 4294965232  ;;  %v202_v0 = vld [vmem:[#allocation4 + $0x168] sm:$0xff]  ;;  %v199_v2 = vld [vmem:[#allocation4 + $0x150] sm:$0xff]  ;;  %vm459_vm0 = vcmask 130048  }
  0x20   :  { %v298_v1 = vld [vmem:[#allocation4 + $0x468] sm:$0xff]  ;;  %472 = vmatpush.msra.mxu0 %v202_v0  ;;  %v295_v4 = vld [vmem:[#allocation4 + $0x450] sm:$0xff]  ;;  %v196_v6 = vld [vmem:[#allocation4 + $0x138] sm:$0xff] }
  0x21   :  { %530 = vmatpush.msra.mxu2 %v298_v1  ;;  %v250_v3 = vld [vmem:[#allocation4 + $0x2e8] sm:$0xff]  ;;  %v247_v7 = vld [vmem:[#allocation4 + $0x2d0] sm:$0xff]  ;;  %v292_v8 = vld [vmem:[#allocation4 + $0x438] sm:$0xff] }
  0x22   :  { %v346_v5 = vld [vmem:[#allocation4 + $0x5e8] sm:$0xff]  ;;  %501 = vmatpush.msra.mxu1 %v250_v3  ;;  %473 = vmatpush.msra.mxu0 %v199_v2  ;;  %v343_v9 = vld [vmem:[#allocation4 + $0x5d0] sm:$0xff]  ;;  %v244_v10 = vld [vmem:[#allocation4 + $0x2b8] sm:$0xff] }
  0x23   :  { %559 = vmatpush.msra.mxu3 %v346_v5  ;;  %531 = vmatpush.msra.mxu2 %v295_v4  ;;  %v193_v11 = vld [vmem:[#allocation4 + $0x120] sm:$0xff]  ;;  %v340_v13 = vld [vmem:[#allocation4 + $0x5b8] sm:$0xff]  ;;  %v190_v16 = vld [vmem:[#allocation4 + $0x108] sm:$0xff] }
  0x24   :  { %502 = vmatpush.msra.mxu1 %v247_v7  ;;  %v289_v12 = vld [vmem:[#allocation4 + $0x420] sm:$0xff]  ;;  %474 = vmatpush.msra.mxu0 %v196_v6  ;;  %v286_v17 = vld [vmem:[#allocation4 + $0x408] sm:$0xff]  ;;  %v187_v20 = vld [vmem:[#allocation4 + $0xf0] sm:$0xff] }
  0x25   :  { %560 = vmatpush.msra.mxu3 %v343_v9  ;;  %532 = vmatpush.msra.mxu2 %v292_v8  ;;  %v241_v14 = vld [vmem:[#allocation4 + $0x2a0] sm:$0xff]  ;;  %v238_v18 = vld [vmem:[#allocation4 + $0x288] sm:$0xff]  ;;  %v283_v21 = vld [vmem:[#allocation4 + $0x3f0] sm:$0xff] }
  0x26   :  { %v337_v15 = vld [vmem:[#allocation4 + $0x5a0] sm:$0xff]  ;;  %503 = vmatpush.msra.mxu1 %v244_v10  ;;  %475 = vmatpush.msra.mxu0 %v193_v11  ;;  %v334_v19 = vld [vmem:[#allocation4 + $0x588] sm:$0xff]  ;;  %v235_v22 = vld [vmem:[#allocation4 + $0x270] sm:$0xff] }
  0x27   :  { %561 = vmatpush.msra.mxu3 %v340_v13  ;;  %533 = vmatpush.msra.mxu2 %v289_v12  ;;  %v331_v23 = vld [vmem:[#allocation4 + $0x570] sm:$0xff]  ;;  %v184_v24 = vld [vmem:[#allocation4 + $0xd8] sm:$0xff]  ;;  %v181_v28 = vld [vmem:[#allocation4 + $0xc0] sm:$0xff] }
  0x28   :  { %504 = vmatpush.msra.mxu1 %v241_v14  ;;  %476 = vmatpush.msra.mxu0 %v190_v16  ;;  %v280_v25 = vld [vmem:[#allocation4 + $0x3d8] sm:$0xff]  ;;  %v277_v29 = vld [vmem:[#allocation4 + $0x3c0] sm:$0xff]  ;;  %v178_v32 = vld [vmem:[#allocation4 + $0xa8] sm:$0xff] }
  0x29   :  { %562 = vmatpush.msra.mxu3 %v337_v15  ;;  %534 = vmatpush.msra.mxu2 %v286_v17  ;;  %v232_v26 = vld [vmem:[#allocation4 + $0x258] sm:$0xff]  ;;  %v229_v30 = vld [vmem:[#allocation4 + $0x240] sm:$0xff]  ;;  %v274_v33 = vld [vmem:[#allocation4 + $0x3a8] sm:$0xff] }
  0x2a   :  { %505 = vmatpush.msra.mxu1 %v238_v18  ;;  %477 = vmatpush.msra.mxu0 %v187_v20  ;;  %v328_v27 = vld [vmem:[#allocation4 + $0x558] sm:$0xff]  ;;  %v325_v31 = vld [vmem:[#allocation4 + $0x540] sm:$0xff]  ;;  %v226_v34 = vld [vmem:[#allocation4 + $0x228] sm:$0xff] }
  0x2b   :  { %563 = vmatpush.msra.mxu3 %v334_v19  ;;  %535 = vmatpush.msra.mxu2 %v283_v21  ;;  %v322_v35 = vld [vmem:[#allocation4 + $0x528] sm:$0xff]  ;;  %v175_v36 = vld [vmem:[#allocation4 + $0x90] sm:$0xff]  ;;  %v172_v40 = vld [vmem:[#allocation4 + $0x78] sm:$0xff] }
  0x2c   :  { %506 = vmatpush.msra.mxu1 %v235_v22  ;;  %478 = vmatpush.msra.mxu0 %v184_v24  ;;  %v271_v37 = vld [vmem:[#allocation4 + $0x390] sm:$0xff]  ;;  %v268_v41 = vld [vmem:[#allocation4 + $0x378] sm:$0xff]  ;;  %v169_v44 = vld [vmem:[#allocation4 + $0x60] sm:$0xff] }
  0x2d   :  { %564 = vmatpush.msra.mxu3 %v331_v23  ;;  %536 = vmatpush.msra.mxu2 %v280_v25  ;;  %v223_v38 = vld [vmem:[#allocation4 + $0x210] sm:$0xff]  ;;  %v220_v42 = vld [vmem:[#allocation4 + $0x1f8] sm:$0xff]  ;;  %v265_v45 = vld [vmem:[#allocation4 + $0x360] sm:$0xff] }
  0x2e   :  { %507 = vmatpush.msra.mxu1 %v232_v26  ;;  %479 = vmatpush.msra.mxu0 %v181_v28  ;;  %v319_v39 = vld [vmem:[#allocation4 + $0x510] sm:$0xff]  ;;  %v316_v43 = vld [vmem:[#allocation4 + $0x4f8] sm:$0xff]  ;;  %v217_v46 = vld [vmem:[#allocation4 + $0x1e0] sm:$0xff] }
  0x2f   :  { %565 = vmatpush.msra.mxu3 %v328_v27  ;;  %537 = vmatpush.msra.mxu2 %v277_v29  ;;  %v313_v47 = vld [vmem:[#allocation4 + $0x4e0] sm:$0xff]  ;;  %v166_v48 = vld [vmem:[#allocation4 + $0x48] sm:$0xff]  ;;  %v163_v52 = vld [vmem:[#allocation4 + $0x30] sm:$0xff] }
  0x30   :  { %508 = vmatpush.msra.mxu1 %v229_v30  ;;  %480 = vmatpush.msra.mxu0 %v178_v32  ;;  %v262_v49 = vld [vmem:[#allocation4 + $0x348] sm:$0xff]  ;;  %v259_v53 = vld [vmem:[#allocation4 + $0x330] sm:$0xff]  ;;  %v160_v56 = vld [vmem:[#allocation4 + $0x18] sm:$0xff] }
  0x31   :  { %566 = vmatpush.msra.mxu3 %v325_v31  ;;  %538 = vmatpush.msra.mxu2 %v274_v33  ;;  %v214_v50 = vld [vmem:[#allocation4 + $0x1c8] sm:$0xff]  ;;  %v211_v54 = vld [vmem:[#allocation4 + $0x1b0] sm:$0xff]  ;;  %v256_v57 = vld [vmem:[#allocation4 + $0x318] sm:$0xff] }
  0x32   :  { %509 = vmatpush.msra.mxu1 %v226_v34  ;;  %481 = vmatpush.msra.mxu0 %v175_v36  ;;  %v310_v51 = vld [vmem:[#allocation4 + $0x4c8] sm:$0xff]  ;;  %v307_v55 = vld [vmem:[#allocation4 + $0x4b0] sm:$0xff]  ;;  %v208_v58 = vld [vmem:[#allocation4 + $0x198] sm:$0xff] }
  0x33   :  { %567 = vmatpush.msra.mxu3 %v322_v35  ;;  %539 = vmatpush.msra.mxu2 %v271_v37  ;;  %v304_v59 = vld [vmem:[#allocation4 + $0x498] sm:$0xff]  ;;  %v157_v60 = vld [vmem:[#allocation4] sm:$0xff]  ;;  %v1636_v63 = vld [vmem:[#allocation2 + $0x10] sm:$0xff] }
  0x34   :  { %510 = vmatpush.msra.mxu1 %v223_v38  ;;  %482 = vmatpush.msra.mxu0 %v172_v40  ;;  %v253_v61 = vld [vmem:[#allocation4 + $0x300] sm:$0xff]  ;;  %v394_v0 = vld [vmem:[#allocation4 + $0x768] sm:$0xff]  ;;  %v1642_v4 = vld [vmem:[#allocation2 + $0x18] sm:$0xff] }
  0x35   :  { %568 = vmatpush.msra.mxu3 %v319_v39  ;;  %540 = vmatpush.msra.mxu2 %v268_v41  ;;  %v1634_v62 = vld [vmem:[#allocation2] sm:$0xff]  ;;  %v1638_v3 = vld [vmem:[#allocation2 + $0x8] sm:$0xff]  ;;  %v391_v5 = vld [vmem:[#allocation4 + $0x750] sm:$0xff] }
  0x36   :  { %511 = vmatpush.msra.mxu1 %v220_v42  ;;  %483 = vmatpush.msra.mxu0 %v169_v44  ;;  %v205_v1 = vld [vmem:[#allocation4 + $0x180] sm:$0xff]  ;;  %v442_v6 = vld [vmem:[#allocation4 + $0x8e8] sm:$0xff]  ;;  %v203_v7 = vld [vmem:[#allocation4 + $0x170] sm:$0xff] }
  0x37   :  { %569 = vmatpush.msra.mxu3 %v316_v43  ;;  %541 = vmatpush.msra.mxu2 %v265_v45  ;;  %v301_v2 = vld [vmem:[#allocation4 + $0x480] sm:$0xff]  ;;  %v388_v8 = vld [vmem:[#allocation4 + $0x738] sm:$0xff]  ;;  %v439_v9 = vld [vmem:[#allocation4 + $0x8d0] sm:$0xff] }
  0x38   :  { %512 = vmatpush.msra.mxu1 %v217_v46  ;;  %484 = vmatpush.msra.mxu0 %v166_v48  ;;  %v200_v10 = vld [vmem:[#allocation4 + $0x158] sm:$0xff]  ;;  %v385_v11 = vld [vmem:[#allocation4 + $0x720] sm:$0xff]  ;;  %v1648_v16 = vld [vmem:[#allocation2 + $0x48] sm:$0xff] }
  0x39   :  { %570 = vmatpush.msra.mxu3 %v313_v47  ;;  %542 = vmatpush.msra.mxu2 %v262_v49  ;;  %v448_v12 = vld [vmem:[#allocation4 + $0x918] sm:$0xff]  ;;  %v197_v14 = vld [vmem:[#allocation4 + $0x140] sm:$0xff]  ;;  %v382_v17 = vld [vmem:[#allocation4 + $0x708] sm:$0xff] }
  0x3a   :  { %513 = vmatpush.msra.mxu1 %v214_v50  ;;  %485 = vmatpush.msra.mxu0 %v163_v52  ;;  %v436_v13 = vld [vmem:[#allocation4 + $0x8b8] sm:$0xff]  ;;  %v433_v18 = vld [vmem:[#allocation4 + $0x8a0] sm:$0xff]  ;;  %v194_v19 = vld [vmem:[#allocation4 + $0x128] sm:$0xff] }
  0x3b   :  { %571 = vmatpush.msra.mxu3 %v310_v51  ;;  %543 = vmatpush.msra.mxu2 %v259_v53  ;;  %v1646_v15 = vld [vmem:[#allocation2 + $0x38] sm:$0xff]  ;;  %v1650_v20 = vld [vmem:[#allocation2 + $0x40] sm:$0xff]  ;;  %v1654_v21 = vld [vmem:[#allocation2 + $0x50] sm:$0xff] }
  0x3c   :  { %514 = vmatpush.msra.mxu1 %v211_v54  ;;  %486 = vmatpush.msra.mxu0 %v160_v56  ;;  %v379_v22 = vld [vmem:[#allocation4 + $0x6f0] sm:$0xff]  ;;  %v430_v23 = vld [vmem:[#allocation4 + $0x888] sm:$0xff]  ;;  %v376_v25 = vld [vmem:[#allocation4 + $0x6d8] sm:$0xff] }
  0x3d   :  { %572 = vmatpush.msra.mxu3 %v307_v55  ;;  %544 = vmatpush.msra.mxu2 %v256_v57  ;;  %v191_v24 = vld [vmem:[#allocation4 + $0x110] sm:$0xff]  ;;  %v445_v26 = vld [vmem:[#allocation4 + $0x900] sm:$0xff]  ;;  %v188_v28 = vld [vmem:[#allocation4 + $0xf8] sm:$0xff] }
  0x3e   :  { %515 = vmatpush.msra.mxu1 %v208_v58  ;;  %487 = vmatpush.msra.mxu0 %v157_v60  ;;  %v427_v27 = vld [vmem:[#allocation4 + $0x870] sm:$0xff]  ;;  %v373_v29 = vld [vmem:[#allocation4 + $0x6c0] sm:$0xff]  ;;  %v424_v31 = vld [vmem:[#allocation4 + $0x858] sm:$0xff] }
  0x3f   :  { %573 = vmatpush.msra.mxu3 %v304_v59  ;;  %545 = vmatpush.msra.mxu2 %v253_v61  ;;  %v347_v30 = vld [vmem:[#allocation4 + $0x5f0] sm:$0xff]  ;;  %v185_v32 = vld [vmem:[#allocation4 + $0xe0] sm:$0xff]  ;;  %v370_v35 = vld [vmem:[#allocation4 + $0x6a8] sm:$0xff] }
  0x40   :  { %488 = vmatmul.f32.vlgmr.msra.gmra.mxu0 %v1634_v62  ;;  %546 = vmatmul.f32.vlgmr.msra.gmra.mxu2 %v1636_v63  ;;  %v1658_v33 = vld [vmem:[#allocation2 + $0x70] sm:$0xff]  ;;  %v1660_v34 = vld [vmem:[#allocation2 + $0x80] sm:$0xff]  ;;  %v182_v37 = vld [vmem:[#allocation4 + $0xc8] sm:$0xff] }
  0x41   :  { %588 = vmatpush.msrb.mxu0 %v394_v0  ;;  %516 = vmatpush.msra.mxu1 %v205_v1  ;;  %v421_v36 = vld [vmem:[#allocation4 + $0x840] sm:$0xff]  ;;  %v1662_v38 = vld [vmem:[#allocation2 + $0x78] sm:$0xff]  ;;  %v1666_v39 = vld [vmem:[#allocation2 + $0x88] sm:$0xff] }
  0x42   :  { %574 = vmatpush.msra.mxu3 %v301_v2  ;;  %517 = vmatmul.f32.vlgmr.msra.gmra.mxu1 %v1638_v3  ;;  %v367_v40 = vld [vmem:[#allocation4 + $0x690] sm:$0xff]  ;;  %v418_v41 = vld [vmem:[#allocation4 + $0x828] sm:$0xff]  ;;  %v364_v43 = vld [vmem:[#allocation4 + $0x678] sm:$0xff] }
  0x43   :  { %575 = vmatmul.f32.vlgmr.msra.gmra.mxu3 %v1642_v4  ;;  %589 = vmatpush.msrb.mxu0 %v391_v5  ;;  %v179_v42 = vld [vmem:[#allocation4 + $0xb0] sm:$0xff]  ;;  %v344_v44 = vld [vmem:[#allocation4 + $0x5d8] sm:$0xff]  ;;  %v361_v47 = vld [vmem:[#allocation4 + $0x660] sm:$0xff] }
  0x44   :  { %617 = vmatpush.msrb.mxu1 %v442_v6  ;;  %675 = vmatpush.msrb.mxu3 %v203_v7  ;;  %v415_v45 = vld [vmem:[#allocation4 + $0x810] sm:$0xff]  ;;  %v176_v46 = vld [vmem:[#allocation4 + $0x98] sm:$0xff]  ;;  %v341_v48 = vld [vmem:[#allocation4 + $0x5c0] sm:$0xff] }
  0x45   :  { %590 = vmatpush.msrb.mxu0 %v388_v8  ;;  %660 = vmatpush.msrb.mxu2 %v448_v12  ;;  %v412_v49 = vld [vmem:[#allocation4 + $0x7f8] sm:$0xff]  ;;  %v173_v50 = vld [vmem:[#allocation4 + $0x80] sm:$0xff]  ;;  %v1670_v51 = vld [vmem:[#allocation2 + $0xa8] sm:$0xff] }
  0x46   :  { %618 = vmatpush.msrb.mxu1 %v439_v9  ;;  %676 = vmatpush.msrb.mxu3 %v200_v10  ;;  %v1672_v52 = vld [vmem:[#allocation2 + $0xb8] sm:$0xff]  ;;  %v358_v53 = vld [vmem:[#allocation4 + $0x648] sm:$0xff]  ;;  %v409_v54 = vld [vmem:[#allocation4 + $0x7e0] sm:$0xff] }
  0x47   :  { %591 = vmatpush.msrb.mxu0 %v385_v11  ;;  %661 = vmatpush.msrb.mxu2 %v445_v26  ;;  %v170_v55 = vld [vmem:[#allocation4 + $0x68] sm:$0xff]  ;;  %v1674_v56 = vld [vmem:[#allocation2 + $0xb0] sm:$0xff]  ;;  %v1678_v57 = vld [vmem:[#allocation2 + $0xc0] sm:$0xff] }
  0x48   :  { %619 = vmatpush.msrb.mxu1 %v436_v13  ;;  %677 = vmatpush.msrb.mxu3 %v197_v14  ;;  %v355_v58 = vld [vmem:[#allocation4 + $0x630] sm:$0xff]  ;;  %v406_v59 = vld [vmem:[#allocation4 + $0x7c8] sm:$0xff]  ;;  %v352_v61 = vld [vmem:[#allocation4 + $0x618] sm:$0xff] }
  0x49   :  { %491 = vmatmul.f32.gmra.mxu0 %v1646_v15  ;;  %549 = vmatmul.f32.gmra.mxu2 %v1648_v16  ;;  %v167_v60 = vld [vmem:[#allocation4 + $0x50] sm:$0xff]  ;;  %v338_v0 = vld [vmem:[#allocation4 + $0x5a8] sm:$0xff]  ;;  %v164_v2 = vld [vmem:[#allocation4 + $0x38] sm:$0xff] }
  0x4a   :  { %592 = vmatpush.msrb.mxu0 %v382_v17  ;;  %620 = vmatpush.msrb.mxu1 %v433_v18  ;;  %v403_v1 = vld [vmem:[#allocation4 + $0x7b0] sm:$0xff]  ;;  %v349_v5 = vld [vmem:[#allocation4 + $0x600] sm:$0xff]  ;;  %v400_v7 = vld [vmem:[#allocation4 + $0x798] sm:$0xff] }
  0x4b   :  { %678 = vmatpush.msrb.mxu3 %v194_v19  ;;  %520 = vmatmul.f32.gmra.mxu1 %v1650_v20  ;;  %v335_v6 = vld [vmem:[#allocation4 + $0x590] sm:$0xff]  ;;  %v161_v8 = vld [vmem:[#allocation4 + $0x20] sm:$0xff]  ;;  %v158_v13 = vld [vmem:[#allocation4 + $0x8] sm:$0xff] }
  0x4c   :  { %578 = vmatmul.f32.gmra.mxu3 %v1654_v21  ;;  %593 = vmatpush.msrb.mxu0 %v379_v22  ;;  %v1682_v9 = vld [vmem:[#allocation2 + $0x20] sm:$0xff]  ;;  %v1684_v10 = vld [vmem:[#allocation2 + $0x30] sm:$0xff]  ;;  %v1686_v14 = vld [vmem:[#allocation2 + $0x28] sm:$0xff] }
  0x4d   :  { %621 = vmatpush.msrb.mxu1 %v430_v23  ;;  %679 = vmatpush.msrb.mxu3 %v191_v24  ;;  %v251_v11 = vld [vmem:[#allocation4 + $0x2f0] sm:$0xff]  ;;  %v397_v12 = vld [vmem:[#allocation4 + $0x780] sm:$0xff]  ;;  %v248_v17 = vld [vmem:[#allocation4 + $0x2d8] sm:$0xff] }
  0x4e   :  { %594 = vmatpush.msrb.mxu0 %v376_v25  ;;  %762 = vmatpush.msra.mxu2 %v347_v30  ;;  %v299_v18 = vld [vmem:[#allocation4 + $0x470] sm:$0xff]  ;;  %v245_v22 = vld [vmem:[#allocation4 + $0x2c0] sm:$0xff]  ;;  %v332_v23 = vld [vmem:[#allocation4 + $0x578] sm:$0xff] }
  0x4f   :  { %622 = vmatpush.msrb.mxu1 %v427_v27  ;;  %680 = vmatpush.msrb.mxu3 %v188_v28  ;;  %v395_v19 = vld [vmem:[#allocation4 + $0x770] sm:$0xff]  ;;  %v296_v24 = vld [vmem:[#allocation4 + $0x458] sm:$0xff]  ;;  %v242_v26 = vld [vmem:[#allocation4 + $0x2a8] sm:$0xff] }
  0x50   :  { %595 = vmatpush.msrb.mxu0 %v373_v29  ;;  %763 = vmatpush.msra.mxu2 %v344_v44  ;;  %v392_v25 = vld [vmem:[#allocation4 + $0x758] sm:$0xff]  ;;  %v329_v27 = vld [vmem:[#allocation4 + $0x560] sm:$0xff]  ;;  %v326_v44 = vld [vmem:[#allocation4 + $0x548] sm:$0xff] }
  0x51   :  { %623 = vmatpush.msrb.mxu1 %v424_v31  ;;  %681 = vmatpush.msrb.mxu3 %v185_v32  ;;  %v293_v28 = vld [vmem:[#allocation4 + $0x440] sm:$0xff]  ;;  %v1693_v30 = vld [vmem:[#allocation2 + $0x58] sm:$0xff]  ;;  %v1695_v31 = vld [vmem:[#allocation2 + $0x68] sm:$0xff] }
  0x52   :  { %494 = vmatmul.f32.gmra.mxu0 %v1658_v33  ;;  %552 = vmatmul.f32.gmra.mxu2 %v1660_v34  ;;  %v389_v29 = vld [vmem:[#allocation4 + $0x740] sm:$0xff]  ;;  %v239_v32 = vld [vmem:[#allocation4 + $0x290] sm:$0xff] }
  0x53   :  { %596 = vmatpush.msrb.mxu0 %v370_v35  ;;  %624 = vmatpush.msrb.mxu1 %v421_v36  ;;  %v290_v35 = vld [vmem:[#allocation4 + $0x428] sm:$0xff] }
  0x54   :  { %682 = vmatpush.msrb.mxu3 %v182_v37  ;;  %523 = vmatmul.f32.gmra.mxu1 %v1662_v38  ;;  %v386_v36 = vld [vmem:[#allocation4 + $0x728] sm:$0xff]  ;;  %v1697_v37 = vld [vmem:[#allocation2 + $0x60] sm:$0xff] }
  0x55   :  { %581 = vmatmul.f32.gmra.mxu3 %v1666_v39  ;;  %597 = vmatpush.msrb.mxu0 %v367_v40  ;;  %v236_v40 = vld [vmem:[#allocation4 + $0x278] sm:$0xff] }
  0x56   :  { %625 = vmatpush.msrb.mxu1 %v418_v41  ;;  %683 = vmatpush.msrb.mxu3 %v179_v42  ;;  %v287_v41 = vld [vmem:[#allocation4 + $0x410] sm:$0xff] }
  0x57   :  { %598 = vmatpush.msrb.mxu0 %v364_v43  ;;  %764 = vmatpush.msra.mxu2 %v341_v48  ;;  %v383_v42 = vld [vmem:[#allocation4 + $0x710] sm:$0xff]  ;;  %v233_v43 = vld [vmem:[#allocation4 + $0x260] sm:$0xff] }
  0x58   :  { %626 = vmatpush.msrb.mxu1 %v415_v45  ;;  %684 = vmatpush.msrb.mxu3 %v176_v46  ;;  %v284_v45 = vld [vmem:[#allocation4 + $0x3f8] sm:$0xff]  ;;  %v323_v48 = vld [vmem:[#allocation4 + $0x530] sm:$0xff] }
  0x59   :  { %599 = vmatpush.msrb.mxu0 %v361_v47  ;;  %765 = vmatpush.msra.mxu2 %v338_v0  ;;  %v380_v46 = vld [vmem:[#allocation4 + $0x6f8] sm:$0xff]  ;;  %v230_v47 = vld [vmem:[#allocation4 + $0x248] sm:$0xff]  ;;  %v275_v0 = vld [vmem:[#allocation4 + $0x3b0] sm:$0xff] }
  0x5a   :  { %627 = vmatpush.msrb.mxu1 %v412_v49  ;;  %685 = vmatpush.msrb.mxu3 %v173_v50  ;;  %v281_v49 = vld [vmem:[#allocation4 + $0x3e0] sm:$0xff] }
  0x5b   :  { %497 = vmatmul.f32.gmra.mxu0 %v1670_v51  ;;  %555 = vmatmul.f32.gmra.mxu2 %v1672_v52  ;;  %v377_v50 = vld [vmem:[#allocation4 + $0x6e0] sm:$0xff] }
  0x5c   :  { %600 = vmatpush.msrb.mxu0 %v358_v53  ;;  %628 = vmatpush.msrb.mxu1 %v409_v54  ;;  %v1704_v53 = vld [vmem:[#allocation2 + $0x90] sm:$0xff]  ;;  %v1706_v54 = vld [vmem:[#allocation2 + $0xa0] sm:$0xff] }
  0x5d   :  { %686 = vmatpush.msrb.mxu3 %v170_v55  ;;  %526 = vmatmul.f32.gmra.mxu1 %v1674_v56  ;;  %v227_v55 = vld [vmem:[#allocation4 + $0x230] sm:$0xff] }
  0x5e   :  { %584 = vmatmul.f32.gmra.mxu3 %v1678_v57  ;;  %601 = vmatpush.msrb.mxu0 %v355_v58  ;;  %v278_v58 = vld [vmem:[#allocation4 + $0x3c8] sm:$0xff] }
  0x5f   :  { %629 = vmatpush.msrb.mxu1 %v406_v59  ;;  %687 = vmatpush.msrb.mxu3 %v167_v60  ;;  %v374_v59 = vld [vmem:[#allocation4 + $0x6c8] sm:$0xff]  ;;  %v1708_v60 = vld [vmem:[#allocation2 + $0x98] sm:$0xff] }
  0x60   :  { %602 = vmatpush.msrb.mxu0 %v352_v61  ;;  %766 = vmatpush.msra.mxu2 %v335_v6  ;;  %v224_v61 = vld [vmem:[#allocation4 + $0x218] sm:$0xff] }
  0x61   :  { %630 = vmatpush.msrb.mxu1 %v403_v1  ;;  %688 = vmatpush.msrb.mxu3 %v164_v2  ;;  %v320_v1 = vld [vmem:[#allocation4 + $0x518] sm:$0xff]  ;;  %v371_v2 = vld [vmem:[#allocation4 + $0x6b0] sm:$0xff] }
  0x62   :  { %603 = vmatpush.msrb.mxu0 %v349_v5  ;;  %767 = vmatpush.msra.mxu2 %v332_v23  ;;  %v221_v5 = vld [vmem:[#allocation4 + $0x200] sm:$0xff]  ;;  %v272_v6 = vld [vmem:[#allocation4 + $0x398] sm:$0xff]  ;;  %v266_v23 = vld [vmem:[#allocation4 + $0x368] sm:$0xff] }
  0x63   :  { %631 = vmatpush.msrb.mxu1 %v400_v7  ;;  %689 = vmatpush.msrb.mxu3 %v161_v8  ;;  %v317_v7 = vld [vmem:[#allocation4 + $0x500] sm:$0xff]  ;;  %v368_v8 = vld [vmem:[#allocation4 + $0x698] sm:$0xff] }
  0x64   :  { %604 = vmatmul.f32.vlgmr.msrb.gmra.mxu0 %v1682_v9  ;;  %1301 = vmatmul.msk.f32.vlgmr.msrb.gmra.mxu2 %vm459_vm0, %v1684_v10 }
  0x65   :  { %704 = vmatpush.msra.mxu0 %v251_v11  ;;  %632 = vmatpush.msrb.mxu1 %v397_v12  ;;  %v218_v11 = vld [vmem:[#allocation4 + $0x1e8] sm:$0xff]  ;;  %v269_v12 = vld [vmem:[#allocation4 + $0x380] sm:$0xff] }
  0x66   :  { %690 = vmatpush.msrb.mxu3 %v158_v13  ;;  %633 = vmatmul.f32.vlgmr.msrb.gmra.mxu1 %v1686_v14  ;;  %v314_v13 = vld [vmem:[#allocation4 + $0x4e8] sm:$0xff] }
  0x67   :  { %691 = vmatmul.f32.vlgmr.msrb.gmra.mxu3 %v1634_v62  ;;  %705 = vmatpush.msra.mxu0 %v248_v17  ;;  %v365_v17 = vld [vmem:[#allocation4 + $0x680] sm:$0xff] }
  0x68   :  { %733 = vmatpush.msra.mxu1 %v299_v18  ;;  %791 = vmatpush.msra.mxu3 %v395_v19  ;;  %v1715_v18 = vld [vmem:[#allocation2 + $0xc8] sm:$0xff]  ;;  %v1717_v19 = vld [vmem:[#allocation2 + $0xd8] sm:$0xff] }
  0x69   :  { %706 = vmatpush.msra.mxu0 %v245_v22  ;;  %768 = vmatpush.msra.mxu2 %v329_v27  ;;  %v215_v22 = vld [vmem:[#allocation4 + $0x1d0] sm:$0xff]  ;;  %v212_v27 = vld [vmem:[#allocation4 + $0x1b8] sm:$0xff] }
  0x6a   :  { %734 = vmatpush.msra.mxu1 %v296_v24  ;;  %792 = vmatpush.msra.mxu3 %v392_v25  ;;  %v311_v24 = vld [vmem:[#allocation4 + $0x4d0] sm:$0xff]  ;;  %v362_v25 = vld [vmem:[#allocation4 + $0x668] sm:$0xff] }
  0x6b   :  { %707 = vmatpush.msra.mxu0 %v242_v26  ;;  %769 = vmatpush.msra.mxu2 %v326_v44  ;;  %v1720_v26 = vld [vmem:[#allocation2 + $0xd0] sm:$0xff]  ;;  %v302_v44 = vld [vmem:[#allocation4 + $0x488] sm:$0xff] }
  0x6c   :  { %735 = vmatpush.msra.mxu1 %v293_v28  ;;  %793 = vmatpush.msra.mxu3 %v389_v29  ;;  %v263_v28 = vld [vmem:[#allocation4 + $0x350] sm:$0xff]  ;;  %v308_v29 = vld [vmem:[#allocation4 + $0x4b8] sm:$0xff] }
  0x6d   :  { %607 = vmatmul.f32.gmra.mxu0 %v1693_v30  ;;  %1302 = vmatmul.msk.f32.gmra.mxu2 %vm459_vm0, %v1695_v31 }
  0x6e   :  { %708 = vmatpush.msra.mxu0 %v239_v32  ;;  %736 = vmatpush.msra.mxu1 %v290_v35  ;;  %v359_v32 = vld [vmem:[#allocation4 + $0x650] sm:$0xff]  ;;  %v209_v35 = vld [vmem:[#allocation4 + $0x1a0] sm:$0xff] }
  0x6f   :  { %794 = vmatpush.msra.mxu3 %v386_v36  ;;  %636 = vmatmul.f32.gmra.mxu1 %v1697_v37  ;;  %v260_v36 = vld [vmem:[#allocation4 + $0x338] sm:$0xff] }
  0x70   :  { %694 = vmatmul.f32.gmra.mxu3 %v1646_v15  ;;  %709 = vmatpush.msra.mxu0 %v236_v40  ;;  %v305_v40 = vld [vmem:[#allocation4 + $0x4a0] sm:$0xff] }
  0x71   :  { %737 = vmatpush.msra.mxu1 %v287_v41  ;;  %795 = vmatpush.msra.mxu3 %v383_v42  ;;  %v356_v41 = vld [vmem:[#allocation4 + $0x638] sm:$0xff]  ;;  %v206_v42 = vld [vmem:[#allocation4 + $0x188] sm:$0xff] }
  0x72   :  { %710 = vmatpush.msra.mxu0 %v233_v43  ;;  %770 = vmatpush.msra.mxu2 %v323_v48  ;;  %v257_v43 = vld [vmem:[#allocation4 + $0x320] sm:$0xff]  ;;  %v350_v48 = vld [vmem:[#allocation4 + $0x608] sm:$0xff] }
  0x73   :  { %738 = vmatpush.msra.mxu1 %v284_v45  ;;  %796 = vmatpush.msra.mxu3 %v380_v46  ;;  %v353_v45 = vld [vmem:[#allocation4 + $0x620] sm:$0xff]  ;;  %v443_v46 = vld [vmem:[#allocation4 + $0x8f0] sm:$0xff] }
  0x74   :  { %711 = vmatpush.msra.mxu0 %v230_v47  ;;  %771 = vmatpush.msra.mxu2 %v320_v1  ;;  %v254_v47 = vld [vmem:[#allocation4 + $0x308] sm:$0xff]  ;;  %v249_v1 = vld [vmem:[#allocation4 + $0x2e0] sm:$0xff] }
  0x75   :  { %739 = vmatpush.msra.mxu1 %v281_v49  ;;  %797 = vmatpush.msra.mxu3 %v377_v50  ;;  %v204_v49 = vld [vmem:[#allocation4 + $0x178] sm:$0xff] }
  0x76   :  { %610 = vmatmul.f32.gmra.mxu0 %v1704_v53  ;;  %1303 = vmatmul.msk.f32.gmra.mxu2 %vm459_vm0, %v1706_v54  ;;  %v440_v50 = vld [vmem:[#allocation4 + $0x8d8] sm:$0xff] }
  0x77   :  { %712 = vmatpush.msra.mxu0 %v227_v55  ;;  %740 = vmatpush.msra.mxu1 %v278_v58  ;;  %v201_v55 = vld [vmem:[#allocation4 + $0x160] sm:$0xff]  ;;  %v252_v58 = vld [vmem:[#allocation4 + $0x2f8] sm:$0xff] }
  0x78   :  { %798 = vmatpush.msra.mxu3 %v374_v59  ;;  %639 = vmatmul.f32.gmra.mxu1 %v1708_v60  ;;  %v437_v59 = vld [vmem:[#allocation4 + $0x8c0] sm:$0xff] }
  0x79   :  { %697 = vmatmul.f32.gmra.mxu3 %v1658_v33  ;;  %713 = vmatpush.msra.mxu0 %v224_v61  ;;  %v449_v61 = vld [vmem:[#allocation4 + $0x920] sm:$0xff] }
  0x7a   :  { %741 = vmatpush.msra.mxu1 %v275_v0  ;;  %799 = vmatpush.msra.mxu3 %v371_v2  ;;  %v198_v0 = vld [vmem:[#allocation4 + $0x148] sm:$0xff] }
  0x7b   :  { %714 = vmatpush.msra.mxu0 %v221_v5  ;;  %772 = vmatpush.msra.mxu2 %v317_v7  ;;  %v434_v2 = vld [vmem:[#allocation4 + $0x8a8] sm:$0xff]  ;;  %v195_v5 = vld [vmem:[#allocation4 + $0x130] sm:$0xff] }
  0x7c   :  { %742 = vmatpush.msra.mxu1 %v272_v6  ;;  %800 = vmatpush.msra.mxu3 %v368_v8  ;;  %v246_v6 = vld [vmem:[#allocation4 + $0x2c8] sm:$0xff]  ;;  %v431_v7 = vld [vmem:[#allocation4 + $0x890] sm:$0xff] }
  0x7d   :  { %715 = vmatpush.msra.mxu0 %v218_v11  ;;  %773 = vmatpush.msra.mxu2 %v314_v13  ;;  %v243_v8 = vld [vmem:[#allocation4 + $0x2b0] sm:$0xff]  ;;  %v428_v11 = vld [vmem:[#allocation4 + $0x878] sm:$0xff] }
  0x7e   :  { %743 = vmatpush.msra.mxu1 %v269_v12  ;;  %801 = vmatpush.msra.mxu3 %v365_v17  ;;  %v189_v12 = vld [vmem:[#allocation4 + $0x100] sm:$0xff]  ;;  %v240_v13 = vld [vmem:[#allocation4 + $0x298] sm:$0xff] }
  0x7f   :  { %613 = vmatmul.f32.gmra.mxu0 %v1715_v18  ;;  %1304 = vmatmul.msk.f32.gmra.mxu2 %vm459_vm0, %v1717_v19  ;;  %v425_v17 = vld [vmem:[#allocation4 + $0x860] sm:$0xff] }
  0x80   :  { %716 = vmatpush.msra.mxu0 %v215_v22  ;;  %744 = vmatpush.msra.mxu1 %v266_v23  ;;  %v348_v22 = vld [vmem:[#allocation4 + $0x5f8] sm:$0xff]  ;;  %v186_v23 = vld [vmem:[#allocation4 + $0xe8] sm:$0xff] }
  0x81   :  { %774 = vmatpush.msra.mxu2 %v311_v24  ;;  %802 = vmatpush.msra.mxu3 %v362_v25  ;;  %v237_v24 = vld [vmem:[#allocation4 + $0x280] sm:$0xff]  ;;  %v422_v25 = vld [vmem:[#allocation4 + $0x848] sm:$0xff] }
  0x82   :  { %642 = vmatmul.f32.gmra.mxu1 %v1720_v26  ;;  %700 = vmatmul.f32.gmra.mxu3 %v1670_v51 }
  0x83   :  { %717 = vmatpush.msra.mxu0 %v212_v27  ;;  %745 = vmatpush.msra.mxu1 %v263_v28  ;;  %v345_v27 = vld [vmem:[#allocation4 + $0x5e0] sm:$0xff]  ;;  %v234_v28 = vld [vmem:[#allocation4 + $0x268] sm:$0xff] }
  0x84   :  { %775 = vmatpush.msra.mxu2 %v308_v29  ;;  %803 = vmatpush.msra.mxu3 %v359_v32  ;;  %v419_v29 = vld [vmem:[#allocation4 + $0x830] sm:$0xff] }
  0x85   :  { %718 = vmatpush.msra.mxu0 %v209_v35  ;;  %746 = vmatpush.msra.mxu1 %v260_v36  ;;  %v231_v32 = vld [vmem:[#allocation4 + $0x250] sm:$0xff]  ;;  %v416_v35 = vld [vmem:[#allocation4 + $0x818] sm:$0xff]  ;;  %v177_v36 = vld [vmem:[#allocation4 + $0xa0] sm:$0xff] }
  0x86   :  { %776 = vmatpush.msra.mxu2 %v305_v40  ;;  %804 = vmatpush.msra.mxu3 %v356_v41  ;;  %v228_v40 = vld [vmem:[#allocation4 + $0x238] sm:$0xff]  ;;  %v413_v41 = vld [vmem:[#allocation4 + $0x800] sm:$0xff] }
  0x87   :  { %719 = vmatpush.msra.mxu0 %v206_v42  ;;  %747 = vmatpush.msra.mxu1 %v257_v43  ;;  %v342_v42 = vld [vmem:[#allocation4 + $0x5c8] sm:$0xff] }
  0x88   :  { %777 = vmatpush.msra.mxu2 %v302_v44  ;;  %805 = vmatpush.msra.mxu3 %v353_v45  ;;  %v174_v43 = vld [vmem:[#allocation4 + $0x88] sm:$0xff]  ;;  %v225_v44 = vld [vmem:[#allocation4 + $0x220] sm:$0xff] }
  0x89   :  { %720 = vmatmul.f32.vlgmr.msra.gmra.mxu0 %v1638_v3  ;;  %778 = vmatmul.f32.vlgmr.msra.gmra.mxu2 %v1642_v4  ;;  %v446_v4 = vld [vmem:[#allocation4 + $0x908] sm:$0xff] }
  0x8a   :  { %820 = vmatpush.msrb.mxu0 %v443_v46  ;;  %748 = vmatpush.msra.mxu1 %v254_v47  ;;  %v410_v45 = vld [vmem:[#allocation4 + $0x7e8] sm:$0xff]  ;;  %v339_v46 = vld [vmem:[#allocation4 + $0x5b0] sm:$0xff] }
  0x8b   :  { %806 = vmatpush.msra.mxu3 %v350_v48  ;;  %878 = vmatpush.msrb.mxu2 %v204_v49  ;;  %v222_v47 = vld [vmem:[#allocation4 + $0x208] sm:$0xff]  ;;  %v407_v48 = vld [vmem:[#allocation4 + $0x7d0] sm:$0xff] }
  0x8c   :  { %749 = vmatmul.f32.vlgmr.msra.gmra.mxu1 %v1636_v63  ;;  %807 = vmatmul.f32.vlgmr.msra.gmra.mxu3 %v1682_v9  ;;  %v192_v63 = vld [vmem:[#allocation4 + $0x118] sm:$0xff]  ;;  %v219_v49 = vld [vmem:[#allocation4 + $0x1f0] sm:$0xff] }
  0x8d   :  { %821 = vmatpush.msrb.mxu0 %v440_v50  ;;  %879 = vmatpush.msrb.mxu2 %v201_v55  ;;  %v404_v50 = vld [vmem:[#allocation4 + $0x7b8] sm:$0xff]  ;;  %v165_v55 = vld [vmem:[#allocation4 + $0x40] sm:$0xff] }
  0x8e   :  { %907 = vmatpush.msrb.mxu3 %v252_v58  ;;  %863 = vmatpush.msrb.mxu1 %v449_v61  ;;  %v216_v58 = vld [vmem:[#allocation4 + $0x1d8] sm:$0xff] }
  0x8f   :  { %822 = vmatpush.msrb.mxu0 %v437_v59  ;;  %880 = vmatpush.msrb.mxu2 %v198_v0  ;;  %v401_v59 = vld [vmem:[#allocation4 + $0x7a0] sm:$0xff]  ;;  %v336_v61 = vld [vmem:[#allocation4 + $0x598] sm:$0xff]  ;;  %v162_v0 = vld [vmem:[#allocation4 + $0x28] sm:$0xff] }
  0x90   :  { %908 = vmatpush.msrb.mxu3 %v249_v1  ;;  %864 = vmatpush.msrb.mxu1 %v446_v4  ;;  %v213_v1 = vld [vmem:[#allocation4 + $0x1c0] sm:$0xff] }
  0x91   :  { %823 = vmatpush.msrb.mxu0 %v434_v2  ;;  %881 = vmatpush.msrb.mxu2 %v195_v5  ;;  %v398_v2 = vld [vmem:[#allocation4 + $0x788] sm:$0xff]  ;;  %v333_v4 = vld [vmem:[#allocation4 + $0x580] sm:$0xff] }
  0x92   :  { %909 = vmatpush.msrb.mxu3 %v246_v6  ;;  %723 = vmatmul.f32.gmra.mxu0 %v1650_v20  ;;  %v210_v5 = vld [vmem:[#allocation4 + $0x1a8] sm:$0xff]  ;;  %v300_v6 = vld [vmem:[#allocation4 + $0x478] sm:$0xff] }
  0x93   :  { %781 = vmatmul.f32.gmra.mxu2 %v1654_v21  ;;  %824 = vmatpush.msrb.mxu0 %v431_v7  ;;  %v183_v21 = vld [vmem:[#allocation4 + $0xd0] sm:$0xff]  ;;  %v396_v7 = vld [vmem:[#allocation4 + $0x778] sm:$0xff] }
  0x94   :  { %882 = vmatpush.msrb.mxu2 %v192_v63  ;;  %910 = vmatpush.msrb.mxu3 %v243_v8  ;;  %v297_v63 = vld [vmem:[#allocation4 + $0x460] sm:$0xff] }
  0x95   :  { %752 = vmatmul.f32.gmra.mxu1 %v1648_v16  ;;  %810 = vmatmul.f32.gmra.mxu3 %v1693_v30  ;;  %v180_v16 = vld [vmem:[#allocation4 + $0xb8] sm:$0xff]  ;;  %v393_v8 = vld [vmem:[#allocation4 + $0x760] sm:$0xff] }
  0x96   :  { %825 = vmatpush.msrb.mxu0 %v428_v11  ;;  %883 = vmatpush.msrb.mxu2 %v189_v12  ;;  %v444_v11 = vld [vmem:[#allocation4 + $0x8f8] sm:$0xff]  ;;  %v294_v12 = vld [vmem:[#allocation4 + $0x448] sm:$0xff] }
  0x97   :  { %911 = vmatpush.msrb.mxu3 %v240_v13  ;;  %965 = vmatpush.msra.mxu1 %v348_v22  ;;  %v330_v13 = vld [vmem:[#allocation4 + $0x568] sm:$0xff]  ;;  %v441_v22 = vld [vmem:[#allocation4 + $0x8e0] sm:$0xff] }
  0x98   :  { %826 = vmatpush.msrb.mxu0 %v425_v17  ;;  %884 = vmatpush.msrb.mxu2 %v186_v23  ;;  %v390_v17 = vld [vmem:[#allocation4 + $0x748] sm:$0xff]  ;;  %v291_v23 = vld [vmem:[#allocation4 + $0x430] sm:$0xff] }
  0x99   :  { %912 = vmatpush.msrb.mxu3 %v237_v24  ;;  %966 = vmatpush.msra.mxu1 %v345_v27  ;;  %v387_v24 = vld [vmem:[#allocation4 + $0x730] sm:$0xff]  ;;  %v288_v27 = vld [vmem:[#allocation4 + $0x418] sm:$0xff] }
  0x9a   :  { %827 = vmatpush.msrb.mxu0 %v422_v25  ;;  %885 = vmatpush.msrb.mxu2 %v183_v21  ;;  %v438_v25 = vld [vmem:[#allocation4 + $0x8c8] sm:$0xff]  ;;  %v384_v21 = vld [vmem:[#allocation4 + $0x718] sm:$0xff] }
  0x9b   :  { %913 = vmatpush.msrb.mxu3 %v234_v28  ;;  %726 = vmatmul.f32.gmra.mxu0 %v1662_v38  ;;  %v285_v28 = vld [vmem:[#allocation4 + $0x400] sm:$0xff] }
  0x9c   :  { %784 = vmatmul.f32.gmra.mxu2 %v1666_v39  ;;  %828 = vmatpush.msrb.mxu0 %v419_v29  ;;  %v171_v39 = vld [vmem:[#allocation4 + $0x70] sm:$0xff]  ;;  %v381_v29 = vld [vmem:[#allocation4 + $0x700] sm:$0xff] }
  0x9d   :  { %886 = vmatpush.msrb.mxu2 %v180_v16  ;;  %914 = vmatpush.msrb.mxu3 %v231_v32  ;;  %v432_v16 = vld [vmem:[#allocation4 + $0x898] sm:$0xff]  ;;  %v282_v32 = vld [vmem:[#allocation4 + $0x3e8] sm:$0xff] }
  0x9e   :  { %755 = vmatmul.f32.gmra.mxu1 %v1660_v34  ;;  %813 = vmatmul.f32.gmra.mxu3 %v1704_v53  ;;  %v168_v34 = vld [vmem:[#allocation4 + $0x58] sm:$0xff] }
  0x9f   :  { %829 = vmatpush.msrb.mxu0 %v416_v35  ;;  %887 = vmatpush.msrb.mxu2 %v177_v36  ;;  %v324_v35 = vld [vmem:[#allocation4 + $0x538] sm:$0xff]  ;;  %v378_v36 = vld [vmem:[#allocation4 + $0x6e8] sm:$0xff] }
  0xa0   :  { %915 = vmatpush.msrb.mxu3 %v228_v40  ;;  %967 = vmatpush.msra.mxu1 %v342_v42  ;;  %v429_v40 = vld [vmem:[#allocation4 + $0x880] sm:$0xff]  ;;  %v375_v42 = vld [vmem:[#allocation4 + $0x6d0] sm:$0xff] }
  0xa1   :  { %830 = vmatpush.msrb.mxu0 %v413_v41  ;;  %888 = vmatpush.msrb.mxu2 %v174_v43  ;;  %v279_v41 = vld [vmem:[#allocation4 + $0x3d0] sm:$0xff]  ;;  %v426_v43 = vld [vmem:[#allocation4 + $0x868] sm:$0xff] }
  0xa2   :  { %916 = vmatpush.msrb.mxu3 %v225_v44  ;;  %968 = vmatpush.msra.mxu1 %v339_v46  ;;  %v372_v46 = vld [vmem:[#allocation4 + $0x6b8] sm:$0xff] }
  0xa3   :  { %831 = vmatpush.msrb.mxu0 %v410_v45  ;;  %889 = vmatpush.msrb.mxu2 %v171_v39  ;;  %v276_v45 = vld [vmem:[#allocation4 + $0x3b8] sm:$0xff] }
  0xa4   :  { %917 = vmatpush.msrb.mxu3 %v222_v47  ;;  %729 = vmatmul.f32.gmra.mxu0 %v1674_v56  ;;  %v273_v47 = vld [vmem:[#allocation4 + $0x3a0] sm:$0xff] }
  0xa5   :  { %787 = vmatmul.f32.gmra.mxu2 %v1678_v57  ;;  %832 = vmatpush.msrb.mxu0 %v407_v48  ;;  %v159_v57 = vld [vmem:[#allocation4 + $0x10] sm:$0xff]  ;;  %v369_v48 = vld [vmem:[#allocation4 + $0x6a0] sm:$0xff] }
  0xa6   :  { %890 = vmatpush.msrb.mxu2 %v168_v34  ;;  %918 = vmatpush.msrb.mxu3 %v219_v49  ;;  %v420_v34 = vld [vmem:[#allocation4 + $0x838] sm:$0xff]  ;;  %v270_v49 = vld [vmem:[#allocation4 + $0x388] sm:$0xff] }
  0xa7   :  { %758 = vmatmul.f32.gmra.mxu1 %v1672_v52  ;;  %816 = vmatmul.f32.gmra.mxu3 %v1715_v18  ;;  %v207_v52 = vld [vmem:[#allocation4 + $0x190] sm:$0xff] }
  0xa8   :  { %833 = vmatpush.msrb.mxu0 %v404_v50  ;;  %891 = vmatpush.msrb.mxu2 %v165_v55  ;;  %v318_v50 = vld [vmem:[#allocation4 + $0x508] sm:$0xff] }
  0xa9   :  { %919 = vmatpush.msrb.mxu3 %v216_v58  ;;  %969 = vmatpush.msra.mxu1 %v336_v61  ;;  %v366_v55 = vld [vmem:[#allocation4 + $0x688] sm:$0xff]  ;;  %v417_v58 = vld [vmem:[#allocation4 + $0x820] sm:$0xff]  ;;  %v315_v61 = vld [vmem:[#allocation4 + $0x4f0] sm:$0xff] }
  0xaa   :  { %834 = vmatpush.msrb.mxu0 %v401_v59  ;;  %892 = vmatpush.msrb.mxu2 %v162_v0  ;;  %v363_v0 = vld [vmem:[#allocation4 + $0x670] sm:$0xff] }
  0xab   :  { %920 = vmatpush.msrb.mxu3 %v213_v1  ;;  %970 = vmatpush.msra.mxu1 %v333_v4  ;;  %v414_v1 = vld [vmem:[#allocation4 + $0x808] sm:$0xff] }
  0xac   :  { %835 = vmatpush.msrb.mxu0 %v398_v2  ;;  %893 = vmatpush.msrb.mxu2 %v159_v57  ;;  %v360_v57 = vld [vmem:[#allocation4 + $0x658] sm:$0xff] }
  0xad   :  { %921 = vmatpush.msrb.mxu3 %v210_v5  ;;  %836 = vmatmul.f32.vlgmr.msrb.gmra.mxu0 %v1686_v14  ;;  %v411_v5 = vld [vmem:[#allocation4 + $0x7f0] sm:$0xff] }
  0xae   :  { %894 = vmatmul.f32.vlgmr.msrb.gmra.mxu2 %v1634_v62  ;;  %936 = vmatpush.msra.mxu0 %v300_v6  ;;  %v327_v62 = vld [vmem:[#allocation4 + $0x550] sm:$0xff] }
  0xaf   :  { %922 = vmatpush.msrb.mxu3 %v207_v52  ;;  %994 = vmatpush.msra.mxu2 %v396_v7  ;;  %v261_v52 = vld [vmem:[#allocation4 + $0x340] sm:$0xff]  ;;  %v312_v7 = vld [vmem:[#allocation4 + $0x4d8] sm:$0xff] }
  0xb0   :  { %1305 = vmatmul.msk.f32.vlgmr.msrb.gmra.mxu1 %vm459_vm0, %v1684_v10  ;;  %923 = vmatmul.f32.vlgmr.msrb.gmra.mxu3 %v1638_v3  ;;  %v435_v3 = vld [vmem:[#allocation4 + $0x8b0] sm:$0xff] }
  0xb1   :  { %937 = vmatpush.msra.mxu0 %v297_v63  ;;  %995 = vmatpush.msra.mxu2 %v393_v8  ;;  %v357_v63 = vld [vmem:[#allocation4 + $0x640] sm:$0xff]  ;;  %v408_v8 = vld [vmem:[#allocation4 + $0x7d8] sm:$0xff] }
  0xb2   :  { %1023 = vmatpush.msra.mxu3 %v444_v11  ;;  %971 = vmatpush.msra.mxu1 %v330_v13  ;;  %v258_v11 = vld [vmem:[#allocation4 + $0x328] sm:$0xff] }
  0xb3   :  { %938 = vmatpush.msra.mxu0 %v294_v12  ;;  %996 = vmatpush.msra.mxu2 %v390_v17  ;;  %v309_v12 = vld [vmem:[#allocation4 + $0x4c0] sm:$0xff]  ;;  %v354_v13 = vld [vmem:[#allocation4 + $0x628] sm:$0xff] }
  0xb4   :  { %1024 = vmatpush.msra.mxu3 %v441_v22  ;;  %972 = vmatpush.msra.mxu1 %v327_v62  ;;  %v255_v22 = vld [vmem:[#allocation4 + $0x310] sm:$0xff] }
  0xb5   :  { %939 = vmatpush.msra.mxu0 %v291_v23  ;;  %997 = vmatpush.msra.mxu2 %v387_v24  ;;  %v306_v23 = vld [vmem:[#allocation4 + $0x4a8] sm:$0xff]  ;;  %v351_v62 = vld [vmem:[#allocation4 + $0x610] sm:$0xff] }
  0xb6   :  { %1025 = vmatpush.msra.mxu3 %v438_v25  ;;  %839 = vmatmul.f32.gmra.mxu0 %v1697_v37  ;;  %v402_v24 = vld [vmem:[#allocation4 + $0x7a8] sm:$0xff] }
  0xb7   :  { %897 = vmatmul.f32.gmra.mxu2 %v1646_v15  ;;  %940 = vmatpush.msra.mxu0 %v288_v27  ;;  %v321_v15 = vld [vmem:[#allocation4 + $0x520] sm:$0xff] }
  0xb8   :  { %998 = vmatpush.msra.mxu2 %v384_v21  ;;  %1026 = vmatpush.msra.mxu3 %v435_v3  ;;  %v303_v21 = vld [vmem:[#allocation4 + $0x490] sm:$0xff] }
  0xb9   :  { %1306 = vmatmul.msk.f32.gmra.mxu1 %vm459_vm0, %v1695_v31  ;;  %926 = vmatmul.f32.gmra.mxu3 %v1650_v20  ;;  %v423_v20 = vld [vmem:[#allocation4 + $0x850] sm:$0xff] }
  0xba   :  { %941 = vmatpush.msra.mxu0 %v285_v28  ;;  %999 = vmatpush.msra.mxu2 %v381_v29  ;;  %v399_v3 = vld [vmem:[#allocation4 + $0x790] sm:$0xff] }
  0xbb   :  { %1027 = vmatpush.msra.mxu3 %v432_v16  ;;  %973 = vmatpush.msra.mxu1 %v324_v35  ;;  %v1376_v29 = vld [vmem:[#allocation2 + $0x10] sm:$0xff] }
  0xbc   :  { %942 = vmatpush.msra.mxu0 %v282_v32  ;;  %1000 = vmatpush.msra.mxu2 %v378_v36  ;;  %v1108_v16 = vld [vmem:[#allocation7 + $0x78] sm:$0xff]  ;;  %v1377_v36 = vld [vmem:[#allocation2 + $0x18] sm:$0xff] }
  0xbd   :  { %1028 = vmatpush.msra.mxu3 %v429_v40  ;;  %v1752_v44 = vpop.f32.mrf.mxu0  ;;  %974 = vmatpush.msra.mxu1 %v321_v15  ;;  %v447_v32 = vld [vmem:[#allocation4 + $0x910] sm:$0xff]  ;;  %v1107_v40 = vld [vmem:[#allocation7 + $0x70] sm:$0xff] }
  0xbe   :  { %943 = vmatpush.msra.mxu0 %v279_v41  ;;  %1001 = vmatpush.msra.mxu2 %v375_v42  ;;  %v1783_v35 = vld [vmem:[#allocation6] sm:$0x7] }
  0xbf   :  { %1029 = vmatpush.msra.mxu3 %v426_v43  ;;  %v1754_v39 = vpop.f32.mrf.mxu1  ;;  %842 = vmatmul.f32.gmra.mxu0 %v1708_v60  ;;  %v1789_v15 = vperm.slane %v1783_v35, 0  ;;  %v1105_v43 = vld [vmem:[#allocation7 + $0x60] sm:$0xff] }
  0xc0   :  { %900 = vmatmul.f32.gmra.mxu2 %v1658_v33  ;;  %944 = vmatpush.msra.mxu0 %v276_v45  ;;  %v267_v33 = vld [vmem:[#allocation4 + $0x370] sm:$0xff] }
  0xc1   :  { %1002 = vmatpush.msra.mxu2 %v372_v46  ;;  %1030 = vmatpush.msra.mxu3 %v423_v20  ;;  %v1378_v46 = vld [vmem:[#allocation2 + $0x48] sm:$0xff] }
  0xc2   :  { %1307 = vmatmul.msk.f32.gmra.mxu1 %vm459_vm0, %v1706_v54  ;;  %929 = vmatmul.f32.gmra.mxu3 %v1662_v38  ;;  %v264_v38 = vld [vmem:[#allocation4 + $0x358] sm:$0xff] }
  0xc3   :  { %945 = vmatpush.msra.mxu0 %v273_v47  ;;  %v1761_v59 = vpop.f32.mrf.mxu2  ;;  %1003 = vmatpush.msra.mxu2 %v369_v48  ;;  %v1104_v47 = vld [vmem:[#allocation7 + $0x58] sm:$0xff] }
  0xc4   :  { %1031 = vmatpush.msra.mxu3 %v420_v34  ;;  %975 = vmatpush.msra.mxu1 %v318_v50  ;;  %v1379_v48 = vld [vmem:[#allocation2 + $0x50] sm:$0xff]  ;;  %v1103_v34 = vld [vmem:[#allocation7 + $0x50] sm:$0xff] }
  0xc5   :  { %946 = vmatpush.msra.mxu0 %v270_v49  ;;  %1004 = vmatpush.msra.mxu2 %v366_v55  ;;  %v1102_v55 = vld [vmem:[#allocation7 + $0x48] sm:$0xff] }
  0xc6   :  { %1032 = vmatpush.msra.mxu3 %v417_v58  ;;  %v1763_v2 = vpop.f32.mrf.mxu0  ;;  %v1765_v4 = vpop.f32.mrf.mxu3  ;;  %976 = vmatpush.msra.mxu1 %v315_v61  ;;  %v1380_v61 = vld [vmem:[#allocation2 + $0x80] sm:$0xff] }
  0xc7   :  { %947 = vmatpush.msra.mxu0 %v267_v33  ;;  %1005 = vmatpush.msra.mxu2 %v363_v0  ;;  %v1101_v33 = vld [vmem:[#allocation7 + $0x40] sm:$0xff] }
  0xc8   :  { %1033 = vmatpush.msra.mxu3 %v414_v1  ;;  %v1767_v6 = vpop.f32.mrf.mxu1  ;;  %845 = vmatmul.f32.gmra.mxu0 %v1720_v26 }
  0xc9   :  { %903 = vmatmul.f32.gmra.mxu2 %v1670_v51  ;;  %948 = vmatpush.msra.mxu0 %v264_v38  ;;  %v405_v51 = vld [vmem:[#allocation4 + $0x7c0] sm:$0xff]  ;;  %v1381_v38 = vld [vmem:[#allocation2 + $0x88] sm:$0xff] }
  0xca   :  { %1006 = vmatpush.msra.mxu2 %v360_v57  ;;  %1034 = vmatpush.msra.mxu3 %v411_v5 }
  0xcb   :  { %1308 = vmatmul.msk.f32.gmra.mxu1 %vm459_vm0, %v1717_v19  ;;  %932 = vmatmul.f32.gmra.mxu3 %v1674_v56  ;;  %v450_v56 = vld [vmem:[#allocation4 + $0x928] sm:$0xff] }
  0xcc   :  { %949 = vmatpush.msra.mxu0 %v261_v52  ;;  %v1774_v17 = vpop.f32.mrf.mxu2  ;;  %977 = vmatpush.msra.mxu1 %v312_v7  ;;  %v1098_v52 = vld [vmem:[#allocation7 + $0x28] sm:$0xff]  ;;  %v1097_v7 = vld [vmem:[#allocation7 + $0x20] sm:$0xff] }
  0xcd   :  { %1007 = vmatpush.msra.mxu2 %v357_v63  ;;  %1035 = vmatpush.msra.mxu3 %v408_v8  ;;  %v1382_v63 = vld [vmem:[#allocation2 + $0xb8] sm:$0xff] }
  0xce   :  { %950 = vmatpush.msra.mxu0 %v258_v11  ;;  %978 = vmatpush.msra.mxu1 %v309_v12  ;;  %v1096_v11 = vld [vmem:[#allocation7 + $0x18] sm:$0xff] }
  0xcf   :  { %1008 = vmatpush.msra.mxu2 %v354_v13  ;;  %v1776_v25 = vpop.f32.mrf.mxu0  ;;  %v1778_v27 = vpop.f32.mrf.mxu3  ;;  %1036 = vmatpush.msra.mxu3 %v405_v51  ;;  %v1383_v13 = vld [vmem:[#allocation2 + $0xc0] sm:$0xff] }
  0xd0   :  { %951 = vmatpush.msra.mxu0 %v255_v22  ;;  %979 = vmatpush.msra.mxu1 %v306_v23  ;;  %v1095_v51 = vld [vmem:[#allocation7 + $0x10] sm:$0xff] }
  0xd1   :  { %1009 = vmatpush.msra.mxu2 %v351_v62  ;;  %v1780_v28 = vpop.f32.mrf.mxu1  ;;  %1037 = vmatpush.msra.mxu3 %v402_v24  ;;  %v1094_v24 = vld [vmem:[#allocation7 + $0x8] sm:$0xff] }
  0xd2   :  { %952 = vmatmul.f32.vlgmr.msra.gmra.mxu0 %v1376_v29  ;;  %1010 = vmatmul.f32.vlgmr.msra.gmra.mxu2 %v1682_v9  ;;  %v1106_v9 = vld [vmem:[#allocation7 + $0x68] sm:$0xff] }
  0xd3   :  { %1066 = vmatpush.msrb.mxu0 %v450_v56  ;;  %980 = vmatpush.msra.mxu1 %v303_v21  ;;  %v1093_v21 = vld [vmem:[#allocation7] sm:$0xff] }
  0xd4   :  { %1038 = vmatpush.msra.mxu3 %v399_v3  ;;  %981 = vmatmul.f32.vlgmr.msra.gmra.mxu1 %v1377_v36 }
  0xd5   :  { %1039 = vmatmul.f32.vlgmr.msra.gmra.mxu3 %v1686_v14  ;;  %v1786_v41 = vpop.f32.mrf.mxu2  ;;  %1145 = vmatpush.msrb.mxu1 %v1108_v16  ;;  %v490_v14 = vadd.f32 %v1752_v44, %v1789_v15  ;;  %v1122_v16 = vld [vmem:[#allocation7 + $0xe8] sm:$0xff] }
  0xd6   :  { %1067 = vmatpush.msrb.mxu0 %v447_v32 }
  0xd7   :  { %1146 = vmatpush.msrb.mxu1 %v1107_v40  ;;  %v519_v50 = vadd.f32 %v1754_v39, %v490_v14 }
  0xd8   :  { %v1791_v42 = vpop.f32.mrf.mxu0  ;;  %v1793_v45 = vpop.f32.mrf.mxu3 }
  0xd9   :  { %1147 = vmatpush.msrb.mxu1 %v1106_v9  ;;  %v548_v58 = vadd.f32 %v1761_v59, %v519_v50  ;;  %v1099_v59 = vld [vmem:[#allocation7 + $0x30] sm:$0xff] }
  0xda   :  { %955 = vmatmul.f32.gmra.mxu0 %v1378_v46  ;;  %v1795_v20 = vpop.f32.mrf.mxu1  ;;  %1013 = vmatmul.f32.gmra.mxu2 %v1693_v30  ;;  %v493_v30 = vadd.f32 %v1763_v2, %v1789_v15 }
  0xdb   :  { %1148 = vmatpush.msrb.mxu1 %v1105_v43  ;;  %v577_v39 = vadd.f32 %v1765_v4, %v548_v58  ;;  %v496_v4 = vadd.f32 %v1776_v25, %v1789_v15  ;;  %v1121_v43 = vld [vmem:[#allocation7 + $0xe0] sm:$0xff] }
  0xdc   :  { %984 = vmatmul.f32.gmra.mxu1 %v1379_v48  ;;  %v522_v57 = vadd.f32 %v1767_v6, %v493_v30  ;;  %v1119_v48 = vld [vmem:[#allocation7 + $0xd0] sm:$0xff]  ;;  %v1116_v30 = vld [vmem:[#allocation7 + $0xb8] sm:$0xff] }
  0xdd   :  { %1042 = vmatmul.f32.gmra.mxu3 %v1697_v37  ;;  %1149 = vmatpush.msrb.mxu1 %v1104_v47  ;;  %v1100_v37 = vld [vmem:[#allocation7 + $0x38] sm:$0xff]  ;;  %v525_v23 = vadd.f32 %v1780_v28, %v496_v4  ;;  %v1123_v28 = vld [vmem:[#allocation7 + $0xf0] sm:$0xff] }
  0xde   :  { %v1801_v49 = vpop.f32.mrf.mxu2 }
  0xdf   :  { %1150 = vmatpush.msrb.mxu1 %v1103_v34  ;;  %v554_v25 = vadd.f32 %v1786_v41, %v525_v23  ;;  %v1118_v34 = vld [vmem:[#allocation7 + $0xc8] sm:$0xff] }
  0xe1   :  { %v605_v44 = vpop.f32.mrf.mxu0  ;;  %1151 = vmatpush.msrb.mxu1 %v1102_v55  ;;  %v1808_v0 = vpop.f32.mrf.mxu3  ;;  %v583_v32 = vadd.f32 %v1793_v45, %v554_v25  ;;  %v1120_v45 = vld [vmem:[#allocation7 + $0xd8] sm:$0xff] }
  0xe2   :  { %958 = vmatmul.f32.gmra.mxu0 %v1380_v61  ;;  %1016 = vmatmul.f32.gmra.mxu2 %v1704_v53  ;;  %v606_v5 = vadd.f32 %v605_v44, %v577_v39  ;;  %v551_v53 = vadd.f32 %v1774_v17, %v522_v57  ;;  %v1113_v57 = vld [vmem:[#allocation7 + $0xa0] sm:$0xff] }
  0xe3   :  { %v634_v1 = vpop.f32.mrf.mxu1  ;;  %1152 = vmatpush.msrb.mxu1 %v1101_v33 }
  0xe4   :  { %987 = vmatmul.f32.gmra.mxu1 %v1381_v38  ;;  %v580_v12 = vadd.f32 %v1778_v27, %v551_v53  ;;  %v1124_v27 = vld [vmem:[#allocation7 + $0xf8] sm:$0xff]  ;;  %v1110_v53 = vld [vmem:[#allocation7 + $0x88] sm:$0xff] }
  0xe5   :  { %1045 = vmatmul.f32.gmra.mxu3 %v1708_v60  ;;  %1153 = vmatpush.msrb.mxu1 %v1100_v37  ;;  %v635_v60 = vadd.f32 %v634_v1, %v606_v5  ;;  %v1114_v1 = vld [vmem:[#allocation7 + $0xa8] sm:$0xff] }
  0xe6   :  { %1174 = vmatpush.msrb.mxu2 %v1124_v27 }
  0xe7   :  { %v663_v2 = vpop.f32.mrf.mxu2  ;;  %1154 = vmatpush.msrb.mxu1 %v1099_v59 }
  0xe8   :  { %v664_v17 = vadd.f32 %v663_v2, %v635_v60  ;;  %1175 = vmatpush.msrb.mxu2 %v1123_v28  ;;  %v1111_v2 = vld [vmem:[#allocation7 + $0x90] sm:$0xff]  ;;  %v454_v60 = vperm.slane %v1783_v35, 1 }
  0xe9   :  { %1155 = vmatpush.msrb.mxu1 %v1098_v52 }
  0xea   :  { %961 = vmatmul.f32.gmra.mxu0 %v1382_v63  ;;  %v608_v8 = vpop.f32.mrf.mxu0  ;;  %1019 = vmatmul.f32.gmra.mxu2 %v1715_v18  ;;  %v1819_v22 = vpop.f32.mrf.mxu3  ;;  %v1081_v56 = vmax.f32 %v664_v17, 0.0 }
  0xeb   :  { %1156 = vmatpush.msrb.mxu1 %v1097_v7  ;;  %v609_v62 = vadd.f32 %v608_v8, %v580_v12  ;;  %1176 = vmatpush.msrb.mxu2 %v1122_v16  ;;  %v1109_v8 = vld [vmem:[#allocation7 + $0x80] sm:$0xff]  ;;  %v693_v12 = vadd.f32 %v1819_v22, %v454_v60 }
  0xec   :  { %v637_v6 = vpop.f32.mrf.mxu1  ;;  %990 = vmatmul.f32.gmra.mxu1 %v1383_v13 }
  0xed   :  { %1048 = vmatmul.f32.gmra.mxu3 %v1720_v26  ;;  %1157 = vmatpush.msrb.mxu1 %v1096_v11  ;;  %v499_v26 = vadd.f32 %v1791_v42, %v1789_v15  ;;  %v638_v3 = vadd.f32 %v637_v6, %v609_v62 }
  0xee   :  { %1177 = vmatpush.msrb.mxu2 %v1121_v43 }
  0xef   :  { %1158 = vmatpush.msrb.mxu1 %v1095_v51  ;;  %v528_v41 = vadd.f32 %v1795_v20, %v499_v26 }
  0xf0   :  { %v666_v18 = vpop.f32.mrf.mxu2  ;;  %1178 = vmatpush.msrb.mxu2 %v1120_v45 }
  0xf1   :  { %1159 = vmatpush.msrb.mxu1 %v1094_v24  ;;  %v667_v36 = vadd.f32 %v666_v18, %v638_v3  ;;  %v557_v15 = vadd.f32 %v1801_v49, %v528_v41  ;;  %v1117_v49 = vld [vmem:[#allocation7 + $0xc0] sm:$0xff] }
  0xf2   :  { %1309 = vmatmul.msk.f32.vlgmr.msrb.gmra.mxu0 %vm459_vm0, %v1684_v10  ;;  %1179 = vmatpush.msrb.mxu2 %v1119_v48  ;;  %v1139_v48 = vld [vmem:[#allocation7 + $0x170] sm:$0xff] }
  0xf3   :  { %v611_v29 = vpop.f32.mrf.mxu0  ;;  %1160 = vmatpush.msrb.mxu1 %v1093_v21  ;;  %v1829_v10 = vpop.f32.mrf.mxu3  ;;  %v1084_v42 = vmax.f32 %v667_v36, 0.0  ;;  %v586_v20 = vadd.f32 %v1808_v0, %v557_v15  ;;  %v1115_v0 = vld [vmem:[#allocation7 + $0xb0] sm:$0xff]  ;;  %v1140_v15 = vld [vmem:[#allocation7 + $0x178] sm:$0xff] }
  0xf4   :  { %1161 = vmatmul.f32.vlgmr.msrb.gmra.mxu1 %v1081_v56  ;;  %v612_v9 = vadd.f32 %v611_v29, %v583_v32  ;;  %1180 = vmatpush.msrb.mxu2 %v1118_v34  ;;  %v696_v24 = vadd.f32 %v1829_v10, %v454_v60 }
  0xf5   :  { %v640_v40 = vpop.f32.mrf.mxu1  ;;  %1203 = vmatpush.msrb.mxu3 %v1140_v15 }
  0xf6   :  { %v641_v14 = vadd.f32 %v640_v40, %v612_v9  ;;  %1181 = vmatpush.msrb.mxu2 %v1117_v49  ;;  %v1137_v49 = vld [vmem:[#allocation7 + $0x160] sm:$0xff] }
  0xf7   :  { %1204 = vmatpush.msrb.mxu3 %v1139_v48 }
  0xf8   :  { %1182 = vmatpush.msrb.mxu2 %v1116_v30 }
  0xf9   :  { %v669_v46 = vpop.f32.mrf.mxu2 }
  0xfa   :  { %1310 = vmatmul.msk.f32.gmra.mxu0 %vm459_vm0, %v1695_v31  ;;  %v670_v50 = vadd.f32 %v669_v46, %v641_v14  ;;  %1183 = vmatpush.msrb.mxu2 %v1115_v0 }
  0xfc   :  { %v614_v47 = vpop.f32.mrf.mxu0  ;;  %1164 = vmatmul.f32.gmra.mxu1 %v1084_v42  ;;  %v1087_v33 = vmax.f32 %v670_v50, 0.0  ;;  %v698_v44 = vpop.f32.mrf.mxu3  ;;  %1184 = vmatpush.msrb.mxu2 %v1114_v1  ;;  %v1135_v1 = vld [vmem:[#allocation7 + $0x150] sm:$0xff] }
  0xfd   :  { %v615_v55 = vadd.f32 %v614_v47, %v586_v20  ;;  %v699_v16 = vadd.f32 %v698_v44, %v454_v60 }
  0xfe   :  { %1185 = vmatpush.msrb.mxu2 %v1113_v57 }
  0xff   :  { %v643_v58 = vpop.f32.mrf.mxu1 }
 0x100   :  { %v644_v31 = vadd.f32 %v643_v58, %v615_v55  ;;  %v1138_v55 = vld [vmem:[#allocation7 + $0x168] sm:$0xff] }
 0x101   :  { %1205 = vmatpush.msrb.mxu3 %v1138_v55 }
 0x102   :  { %1311 = vmatmul.msk.f32.gmra.mxu0 %vm459_vm0, %v1706_v54  ;;  %v672_v61 = vpop.f32.mrf.mxu2  ;;  %v1112_v54 = vld [vmem:[#allocation7 + $0x98] sm:$0xff] }
 0x103   :  { %v673_v37 = vadd.f32 %v672_v61, %v644_v31  ;;  %1186 = vmatpush.msrb.mxu2 %v1112_v54  ;;  %1206 = vmatpush.msrb.mxu3 %v1137_v49  ;;  %v1133_v54 = vld [vmem:[#allocation7 + $0x140] sm:$0xff] }
 0x104   :  { %1167 = vmatmul.f32.gmra.mxu1 %v1087_v33  ;;  %v1136_v33 = vld [vmem:[#allocation7 + $0x158] sm:$0xff] }
 0x105   :  { %v1090_v38 = vmax.f32 %v673_v37, 0.0  ;;  %v701_v5 = vpop.f32.mrf.mxu3  ;;  %1187 = vmatpush.msrb.mxu2 %v1111_v2  ;;  %1207 = vmatpush.msrb.mxu3 %v1136_v33 }
 0x106   :  { %v721_v39 = vpop.f32.mrf.mxu0  ;;  %v702_v14 = vadd.f32 %v701_v5, %v454_v60 }
 0x107   :  { %1188 = vmatpush.msrb.mxu2 %v1110_v53  ;;  %v722_v17 = vadd.f32 %v721_v39, %v693_v12  ;;  %1208 = vmatpush.msrb.mxu3 %v1135_v1  ;;  %v1128_v12 = vld [vmem:[#allocation7 + $0x118] sm:$0xff] }
 0x109   :  { %v750_v59 = vpop.f32.mrf.mxu1  ;;  %1189 = vmatpush.msrb.mxu2 %v1109_v8  ;;  %v1131_v8 = vld [vmem:[#allocation7 + $0x130] sm:$0xff] }
 0x10a   :  { %1312 = vmatmul.msk.f32.gmra.mxu0 %vm459_vm0, %v1717_v19  ;;  %v751_v23 = vadd.f32 %v750_v59, %v722_v17  ;;  %v1134_v59 = vld [vmem:[#allocation7 + $0x148] sm:$0xff] }
 0x10b   :  { %1209 = vmatpush.msrb.mxu3 %v1134_v59 }
 0x10c   :  { %1170 = vmatmul.f32.gmra.mxu1 %v1090_v38  ;;  %v779_v7 = vpop.f32.mrf.mxu2 }
 0x10d   :  { %v780_v25 = vadd.f32 %v779_v7, %v751_v23  ;;  %1210 = vmatpush.msrb.mxu3 %v1133_v54 }
 0x10f   :  { %v724_v52 = vpop.f32.mrf.mxu0  ;;  %v808_v4 = vpop.f32.mrf.mxu3 }
 0x110   :  { %v725_v56 = vadd.f32 %v724_v52, %v696_v24  ;;  %v809_v27 = vadd.f32 %v808_v4, %v780_v25  ;;  %v1132_v52 = vld [vmem:[#allocation7 + $0x138] sm:$0xff]  ;;  %v1125_v24 = vld [vmem:[#allocation7 + $0x100] sm:$0xff] }
 0x111   :  { %1211 = vmatpush.msrb.mxu3 %v1132_v52 }
 0x112   :  { %v753_v63 = vpop.f32.mrf.mxu1 }
 0x113   :  { %v754_v29 = vadd.f32 %v753_v63, %v725_v56  ;;  %1212 = vmatpush.msrb.mxu3 %v1131_v8  ;;  %v455_v56 = vperm.slane %v1783_v35, 2 }
 0x116   :  { %v782_v6 = vpop.f32.mrf.mxu2 }
 0x117   :  { %v783_v36 = vadd.f32 %v782_v6, %v754_v29 }
 0x118   :  { %v727_v11 = vpop.f32.mrf.mxu0  ;;  %v811_v13 = vpop.f32.mrf.mxu3 }
 0x119   :  { %v728_v41 = vadd.f32 %v727_v11, %v699_v16  ;;  %v812_v9 = vadd.f32 %v811_v13, %v783_v36  ;;  %v1130_v11 = vld [vmem:[#allocation7 + $0x128] sm:$0xff] }
 0x11a   :  { %1213 = vmatpush.msrb.mxu3 %v1130_v11  ;;  %v1251_v11 = vld [vmem:[#allocation10 + $0x78] sm:$0xff] }
 0x11b   :  { %v756_v19 = vpop.f32.mrf.mxu1  ;;  %1256 = vmatpush.msra.mxu0 %v1251_v11  ;;  %1313 = vmatpush.msra.mxu1 %v1251_v11 }
 0x11c   :  { %v757_v46 = vadd.f32 %v756_v19, %v728_v41  ;;  %v1129_v19 = vld [vmem:[#allocation7 + $0x120] sm:$0xff]  ;;  %1314 = vmatpush.msra.mxu2 %v1251_v11 }
 0x11d   :  { %1214 = vmatpush.msrb.mxu3 %v1129_v19  ;;  %v1249_v19 = vld [vmem:[#allocation10 + $0x68] sm:$0xff] }
 0x11f   :  { %v785_v18 = vpop.f32.mrf.mxu2  ;;  %1215 = vmatpush.msrb.mxu3 %v1128_v12  ;;  %v1248_v12 = vld [vmem:[#allocation10 + $0x60] sm:$0xff] }
 0x120   :  { %v786_v34 = vadd.f32 %v785_v18, %v757_v46 }
 0x121   :  { %v730_v51 = vpop.f32.mrf.mxu0  ;;  %v814_v21 = vpop.f32.mrf.mxu3 }
 0x122   :  { %v731_v58 = vadd.f32 %v730_v51, %v702_v14  ;;  %v815_v44 = vadd.f32 %v814_v21, %v786_v34  ;;  %v1127_v51 = vld [vmem:[#allocation7 + $0x110] sm:$0xff] }
 0x123   :  { %1216 = vmatpush.msrb.mxu3 %v1127_v51  ;;  %v1245_v51 = vld [vmem:[#allocation10 + $0x48] sm:$0xff] }
 0x124   :  { %v759_v62 = vpop.f32.mrf.mxu1 }
 0x125   :  { %v760_v37 = vadd.f32 %v759_v62, %v731_v58  ;;  %v1126_v62 = vld [vmem:[#allocation7 + $0x108] sm:$0xff] }
 0x126   :  { %1217 = vmatpush.msrb.mxu3 %v1126_v62  ;;  %v1243_v62 = vld [vmem:[#allocation10 + $0x38] sm:$0xff] }
 0x128   :  { %v788_v22 = vpop.f32.mrf.mxu2  ;;  %1218 = vmatpush.msrb.mxu3 %v1125_v24  ;;  %v1242_v24 = vld [vmem:[#allocation10 + $0x30] sm:$0xff] }
 0x129   :  { %v789_v38 = vadd.f32 %v788_v22, %v760_v37 }
 0x12a   :  { %v837_v26 = vpop.f32.mrf.mxu0  ;;  %v817_v43 = vpop.f32.mrf.mxu3  ;;  %1315 = vmatpush.msra.mxu3 %v1251_v11 }
 0x12b   :  { %v838_v3 = vadd.f32 %v837_v26, %v809_v27  ;;  %v818_v2 = vadd.f32 %v817_v43, %v789_v38 }
 0x12d   :  { %v866_v28 = vpop.f32.mrf.mxu1 }
 0x12e   :  { %v867_v32 = vadd.f32 %v866_v28, %v838_v3 }
 0x130   :  { %v1082_v40 = vmax.f32 %v867_v32, 0.0 }
 0x131   :  { %v895_v20 = vpop.f32.mrf.mxu2 }
 0x132   :  { %1190 = vmatmul.f32.vlgmr.msrb.gmra.mxu2 %v1082_v40  ;;  %v896_v27 = vadd.f32 %v895_v20, %v455_v56 }
 0x133   :  { %v840_v10 = vpop.f32.mrf.mxu0  ;;  %v924_v31 = vpop.f32.mrf.mxu3 }
 0x134   :  { %v841_v42 = vadd.f32 %v840_v10, %v812_v9  ;;  %v925_v29 = vadd.f32 %v924_v31, %v896_v27  ;;  %v1237_v27 = vld [vmem:[#allocation10 + $0x8] sm:$0xff] }
 0x136   :  { %v869_v45 = vpop.f32.mrf.mxu1 }
 0x137   :  { %v870_v47 = vadd.f32 %v869_v45, %v841_v42 }
 0x139   :  { %v1085_v50 = vmax.f32 %v870_v47, 0.0 }
 0x13a   :  { %v898_v5 = vpop.f32.mrf.mxu2 }
 0x13b   :  { %1193 = vmatmul.f32.gmra.mxu2 %v1085_v50  ;;  %v899_v16 = vadd.f32 %v898_v5, %v455_v56 }
 0x13c   :  { %v843_v61 = vpop.f32.mrf.mxu0  ;;  %v927_v7 = vpop.f32.mrf.mxu3 }
 0x13d   :  { %v844_v30 = vadd.f32 %v843_v61, %v815_v44  ;;  %v928_v40 = vadd.f32 %v927_v7, %v899_v16 }
 0x13f   :  { %v872_v0 = vpop.f32.mrf.mxu1 }
 0x140   :  { %v873_v39 = vadd.f32 %v872_v0, %v844_v30 }
 0x142   :  { %v1088_v57 = vmax.f32 %v873_v39, 0.0 }
 0x143   :  { %v901_v13 = vpop.f32.mrf.mxu2 }
 0x144   :  { %1196 = vmatmul.f32.gmra.mxu2 %v1088_v57  ;;  %v902_v10 = vadd.f32 %v901_v13, %v455_v56  ;;  %v1247_v13 = vld [vmem:[#allocation10 + $0x58] sm:$0xff] }
 0x145   :  { %v846_v53 = vpop.f32.mrf.mxu0  ;;  %v930_v23 = vpop.f32.mrf.mxu3 }
 0x146   :  { %v847_v63 = vadd.f32 %v846_v53, %v818_v2  ;;  %v931_v14 = vadd.f32 %v930_v23, %v902_v10  ;;  %v1244_v23 = vld [vmem:[#allocation10 + $0x40] sm:$0xff] }
 0x148   :  { %v875_v4 = vpop.f32.mrf.mxu1 }
 0x149   :  { %v876_v60 = vadd.f32 %v875_v4, %v847_v63 }
 0x14b   :  { %v1091_v6 = vmax.f32 %v876_v60, 0.0 }
 0x14c   :  { %v904_v18 = vpop.f32.mrf.mxu2 }
 0x14d   :  { %1199 = vmatmul.f32.gmra.mxu2 %v1091_v6  ;;  %v905_v55 = vadd.f32 %v904_v18, %v455_v56  ;;  %v1250_v6 = vld [vmem:[#allocation10 + $0x70] sm:$0xff]  ;;  %v1241_v18 = vld [vmem:[#allocation10 + $0x28] sm:$0xff]  ;;  %v1239_v56 = vld [vmem:[#allocation10 + $0x18] sm:$0xff] }
 0x14e   :  { %v933_v21 = vpop.f32.mrf.mxu3  ;;  %1257 = vmatpush.msra.mxu0 %v1250_v6  ;;  %1316 = vmatpush.msra.mxu1 %v1250_v6 }
 0x14f   :  { %v953_v17 = vpop.f32.mrf.mxu0  ;;  %v934_v31 = vadd.f32 %v933_v21, %v905_v55  ;;  %1317 = vmatpush.msra.mxu2 %v1250_v6  ;;  %1318 = vmatpush.msra.mxu3 %v1250_v6  ;;  %v1238_v21 = vld [vmem:[#allocation10 + $0x10] sm:$0xff] }
 0x150   :  { %v954_v32 = vadd.f32 %v953_v17, %v925_v29  ;;  %1258 = vmatpush.msra.mxu0 %v1249_v19  ;;  %1319 = vmatpush.msra.mxu1 %v1249_v19  ;;  %v1246_v17 = vld [vmem:[#allocation10 + $0x50] sm:$0xff] }
 0x151   :  { %v982_v26 = vpop.f32.mrf.mxu1  ;;  %1320 = vmatpush.msra.mxu2 %v1249_v19  ;;  %1321 = vmatpush.msra.mxu3 %v1249_v19 }
 0x152   :  { %v983_v41 = vadd.f32 %v982_v26, %v954_v32  ;;  %1259 = vmatpush.msra.mxu0 %v1248_v12  ;;  %1322 = vmatpush.msra.mxu1 %v1248_v12  ;;  %v1236_v26 = vld [vmem:[#allocation10] sm:$0xff] }
 0x153   :  { %1323 = vmatpush.msra.mxu2 %v1248_v12  ;;  %1324 = vmatpush.msra.mxu3 %v1248_v12 }
 0x154   :  { %1260 = vmatpush.msra.mxu0 %v1247_v13  ;;  %1325 = vmatpush.msra.mxu1 %v1247_v13 }
 0x155   :  { %v1011_v28 = vpop.f32.mrf.mxu2  ;;  %1326 = vmatpush.msra.mxu2 %v1247_v13  ;;  %1327 = vmatpush.msra.mxu3 %v1247_v13 }
 0x156   :  { %v1012_v43 = vadd.f32 %v1011_v28, %v983_v41  ;;  %1261 = vmatpush.msra.mxu0 %v1246_v17  ;;  %1328 = vmatpush.msra.mxu1 %v1246_v17  ;;  %v1374_v28 = vld [vmem:[#allocation9] ss:$0 sm:$0xff] }
 0x157   :  { %v956_v25 = vpop.f32.mrf.mxu0  ;;  %1329 = vmatpush.msra.mxu2 %v1246_v17  ;;  %1330 = vmatpush.msra.mxu3 %v1246_v17 }
 0x158   :  { %v1040_v36 = vpop.f32.mrf.mxu3  ;;  %v957_v42 = vadd.f32 %v956_v25, %v928_v40  ;;  %1262 = vmatpush.msra.mxu0 %v1245_v51  ;;  %1331 = vmatpush.msra.mxu1 %v1245_v51  ;;  %v1240_v25 = vld [vmem:[#allocation10 + $0x20] sm:$0xff] }
 0x159   :  { %v985_v9 = vpop.f32.mrf.mxu1  ;;  %v1041_v46 = vadd.f32 %v1040_v36, %v1012_v43  ;;  %1332 = vmatpush.msra.mxu2 %v1245_v51  ;;  %1333 = vmatpush.msra.mxu3 %v1245_v51 }
 0x15a   :  { %v986_v47 = vadd.f32 %v985_v9, %v957_v42  ;;  %1263 = vmatpush.msra.mxu0 %v1244_v23  ;;  %1334 = vmatpush.msra.mxu1 %v1244_v23 }
 0x15b   :  { %1335 = vmatpush.msra.mxu2 %v1244_v23  ;;  %1336 = vmatpush.msra.mxu3 %v1244_v23 }
 0x15c   :  { %1264 = vmatpush.msra.mxu0 %v1243_v62  ;;  %1337 = vmatpush.msra.mxu1 %v1243_v62 }
 0x15d   :  { %v1014_v15 = vpop.f32.mrf.mxu2  ;;  %1338 = vmatpush.msra.mxu2 %v1243_v62  ;;  %1339 = vmatpush.msra.mxu3 %v1243_v62 }
 0x15e   :  { %v1015_v34 = vadd.f32 %v1014_v15, %v986_v47  ;;  %1265 = vmatpush.msra.mxu0 %v1242_v24  ;;  %1340 = vmatpush.msra.mxu1 %v1242_v24 }
 0x15f   :  { %v959_v3 = vpop.f32.mrf.mxu0  ;;  %1341 = vmatpush.msra.mxu2 %v1242_v24  ;;  %1342 = vmatpush.msra.mxu3 %v1242_v24 }
 0x160   :  { %v1043_v45 = vpop.f32.mrf.mxu3  ;;  %v960_v58 = vadd.f32 %v959_v3, %v931_v14  ;;  %1266 = vmatpush.msra.mxu0 %v1241_v18  ;;  %1343 = vmatpush.msra.mxu1 %v1241_v18 }
 0x161   :  { %v988_v50 = vpop.f32.mrf.mxu1  ;;  %v1044_v33 = vadd.f32 %v1043_v45, %v1015_v34  ;;  %1344 = vmatpush.msra.mxu2 %v1241_v18  ;;  %1345 = vmatpush.msra.mxu3 %v1241_v18 }
 0x162   :  { %v989_v61 = vadd.f32 %v988_v50, %v960_v58  ;;  %1267 = vmatpush.msra.mxu0 %v1240_v25  ;;  %1346 = vmatpush.msra.mxu1 %v1240_v25 }
 0x163   :  { %1347 = vmatpush.msra.mxu2 %v1240_v25  ;;  %1348 = vmatpush.msra.mxu3 %v1240_v25 }
 0x164   :  { %1268 = vmatpush.msra.mxu0 %v1239_v56  ;;  %1349 = vmatpush.msra.mxu1 %v1239_v56 }
 0x165   :  { %v1017_v49 = vpop.f32.mrf.mxu2  ;;  %1350 = vmatpush.msra.mxu2 %v1239_v56  ;;  %1351 = vmatpush.msra.mxu3 %v1239_v56 }
 0x166   :  { %v1018_v0 = vadd.f32 %v1017_v49, %v989_v61  ;;  %1269 = vmatpush.msra.mxu0 %v1238_v21  ;;  %1352 = vmatpush.msra.mxu1 %v1238_v21  ;;  %v1375_v61 = vld [vmem:[#allocation12] ss:$0 sm:$0xff] }
 0x167   :  { %v962_v22 = vpop.f32.mrf.mxu0  ;;  %1353 = vmatpush.msra.mxu2 %v1238_v21  ;;  %1354 = vmatpush.msra.mxu3 %v1238_v21 }
 0x168   :  { %v1046_v37 = vpop.f32.mrf.mxu3  ;;  %v963_v39 = vadd.f32 %v962_v22, %v934_v31  ;;  %1270 = vmatpush.msra.mxu0 %v1237_v27  ;;  %1355 = vmatpush.msra.mxu1 %v1237_v27 }
 0x169   :  { %v991_v38 = vpop.f32.mrf.mxu1  ;;  %v1047_v59 = vadd.f32 %v1046_v37, %v1018_v0  ;;  %1356 = vmatpush.msra.mxu2 %v1237_v27  ;;  %1357 = vmatpush.msra.mxu3 %v1237_v27 }
 0x16a   :  { %v992_v54 = vadd.f32 %v991_v38, %v963_v39  ;;  %1271 = vmatpush.msra.mxu0 %v1236_v26  ;;  %1358 = vmatpush.msra.mxu1 %v1236_v26 }
 0x16b   :  { %1359 = vmatpush.msra.mxu2 %v1236_v26  ;;  %1360 = vmatpush.msra.mxu3 %v1236_v26 }
 0x16d   :  { %v1020_v57 = vpop.f32.mrf.mxu2 }
 0x16e   :  { %v1021_v2 = vadd.f32 %v1020_v57, %v992_v54 }
 0x16f   :  { %v1069_v35 = vpop.f32.mrf.mxu0 }
 0x170   :  { %v1070_v48 = vadd.f32 %v1069_v35, %v1041_v46  ;;  %v1049_v7 = vpop.f32.mrf.mxu3 }
 0x171   :  { %v1050_v63 = vadd.f32 %v1049_v7, %v1021_v2  ;;  %v1162_v3 = vpop.f32.mrf.mxu1 }
 0x172   :  { %v1083_v20 = vmax.f32 %v1070_v48, 0.0  ;;  %v1163_v16 = vadd.f32 %v1374_v28, %v1162_v3 }
 0x174   :  { %1219 = vmatmul.f32.vlgmr.msrb.gmra.mxu3 %v1083_v20 }
 0x177   :  { %v1072_v44 = vpop.f32.mrf.mxu0 }
 0x178   :  { %v1073_v30 = vadd.f32 %v1072_v44, %v1044_v33 }
 0x179   :  { %v1165_v32 = vpop.f32.mrf.mxu1 }
 0x17a   :  { %v1086_v1 = vmax.f32 %v1073_v30, 0.0  ;;  %v1166_v43 = vadd.f32 %v1374_v28, %v1165_v32 }
 0x17c   :  { %1222 = vmatmul.f32.gmra.mxu3 %v1086_v1 }
 0x17f   :  { %v1075_v5 = vpop.f32.mrf.mxu0 }
 0x180   :  { %v1076_v52 = vadd.f32 %v1075_v5, %v1047_v59 }
 0x181   :  { %v1168_v10 = vpop.f32.mrf.mxu1 }
 0x182   :  { %v1089_v53 = vmax.f32 %v1076_v52, 0.0  ;;  %v1169_v14 = vadd.f32 %v1374_v28, %v1168_v10 }
 0x184   :  { %1225 = vmatmul.f32.gmra.mxu3 %v1089_v53 }
 0x187   :  { %v1078_v8 = vpop.f32.mrf.mxu0 }
 0x188   :  { %v1079_v4 = vadd.f32 %v1078_v8, %v1050_v63 }
 0x189   :  { %v1171_v20 = vpop.f32.mrf.mxu1 }
 0x18a   :  { %v1092_v60 = vmax.f32 %v1079_v4, 0.0  ;;  %v1172_v58 = vadd.f32 %v1374_v28, %v1171_v20 }
 0x18c   :  { %1228 = vmatmul.f32.gmra.mxu3 %v1092_v60 }
 0x1b5   :  { %v1191_v29 = vpop.f32.mrf.mxu2 }
 0x1b6   :  { %v1192_v36 = vadd.f32 %v1191_v29, %v1163_v16 }
 0x1be   :  { %v1194_v22 = vpop.f32.mrf.mxu2 }
 0x1bf   :  { %v1195_v15 = vadd.f32 %v1194_v22, %v1166_v43 }
 0x1c7   :  { %v1197_v45 = vpop.f32.mrf.mxu2 }
 0x1c8   :  { %v1198_v47 = vadd.f32 %v1197_v45, %v1169_v14 }
 0x1d0   :  { %v1200_v55 = vpop.f32.mrf.mxu2 }
 0x1d1   :  { %v1201_v49 = vadd.f32 %v1200_v55, %v1172_v58 }
 0x1f7   :  { %v1220_v40 = vpop.f32.mrf.mxu3 }
 0x1f8   :  { %v1221_v41 = vadd.f32 %v1220_v40, %v1192_v36 }
 0x1fa   :  { %v1232_v9 = vmax.f32 %v1221_v41, 0.0 }
 0x1fc   :  { %1272 = vmatmul.f32.vlgmr.msra.gmra.mxu0 %v1232_v9 }
 0x1ff   :  { %v1223_v42 = vpop.f32.mrf.mxu3 }
 0x200   :  { %v1224_v46 = vadd.f32 %v1223_v42, %v1195_v15 }
 0x202   :  { %v1233_v35 = vmax.f32 %v1224_v46, 0.0 }
 0x204   :  { %1275 = vmatmul.f32.vlgmr.msra.gmra.mxu1 %v1233_v35 }
 0x207   :  { %v1226_v48 = vpop.f32.mrf.mxu3 }
 0x208   :  { %v1227_v34 = vadd.f32 %v1226_v48, %v1198_v47 }
 0x20a   :  { %v1234_v50 = vmax.f32 %v1227_v34, 0.0 }
 0x20c   :  { %1278 = vmatmul.f32.vlgmr.msra.gmra.mxu2 %v1234_v50 }
 0x20f   :  { %v1229_v33 = vpop.f32.mrf.mxu3 }
 0x210   :  { %v1230_v44 = vadd.f32 %v1229_v33, %v1201_v49 }
 0x212   :  { %v1235_v31 = vmax.f32 %v1230_v44, 0.0 }
 0x214   :  { %1281 = vmatmul.f32.vlgmr.msra.gmra.mxu3 %v1235_v31 }
 0x279   :  { %v1273_v30 = vpop.f32.mrf.mxu0 }
 0x27a   :  { %v1274_v37 = vadd.f32 %v1375_v61, %v1273_v30 }
 0x27c   :  { %v1285_v0 = vmax.f32 %v1274_v37, 0.0 }
 0x27e   :  { %1289 = vst [vmem:[%s1862_s7] sm:$0xff] %v1285_v0 }
 0x281   :  { %v1276_v1 = vpop.f32.mrf.mxu1 }
 0x282   :  { %v1277_v39 = vadd.f32 %v1375_v61, %v1276_v1 }
 0x284   :  { %v1286_v38 = vmax.f32 %v1277_v39, 0.0 }
 0x286   :  { %1290 = vst [vmem:[%s1862_s7 + $0x8] sm:$0xff] %v1286_v38 }
 0x28f   :  { %v1279_v59 = vpop.f32.mrf.mxu2 }
 0x290   :  { %v1280_v57 = vadd.f32 %v1375_v61, %v1279_v59 }
 0x292   :  { %v1287_v5 = vmax.f32 %v1280_v57, 0.0 }
 0x294   :  { %1291 = vst [vmem:[%s1862_s7 + $0x10] sm:$0xff] %v1287_v5 }
 0x297   :  { %v1282_v54 = vpop.f32.mrf.mxu3 }
 0x298   :  { %v1283_v52 = vadd.f32 %v1375_v61, %v1282_v54 }
 0x29a   :  { %v1288_v2 = vmax.f32 %v1283_v52, 0.0 }
 0x29c   :  { %1292 = vst [vmem:[%s1862_s7 + $0x18] sm:$0xff] %v1288_v2 }
 0x29d   :  { %1297 = vsyncpa [#allocation3], 1 }
 0x29e   :  { %1298 = vsyncpa [#allocation5], 1 }
 0x29f   :  { %1299 = vsyncpa [#allocation8], 1 }
 0x2a0   :  { %1300 = vsyncpa [#allocation11], 1 }

</bundles_post_ra>
